<compile_context>
chip_gen: v7x
topology: tpu7x:2x2x1
jax: 0.10.0
libtpu: 0.0.40
codegen_flags: <defaults>
</compile_context>

<pallas_src>
import functools

import jax
import jax.numpy as jnp
from jax.experimental import pallas as pl
from jax.experimental.pallas import tpu as pltpu


_INV_SQRT2 = 0.7071067811865476


def _round_up(v, m):
    return (v + m - 1) // m * m


def _layernorm(v, g, b, eps=1e-6):
    """LayerNorm over the last axis with f32 statistics (nn.LayerNorm(eps=1e-6))."""
    mu = jnp.mean(v, axis=-1, keepdims=True)
    var = jnp.mean((v - mu) ** 2, axis=-1, keepdims=True)
    return (v - mu) * jax.lax.rsqrt(var + eps) * g + b


def block_kernel(x_ref,
                 g1_ref, b1_ref,
                 wq_ref, bq_ref,
                 wkv_ref, bkv_ref,
                 wproj_ref, bproj_ref,
                 g2_ref, b2_ref,
                 w1_ref, bf1_ref,
                 w2_ref, bf2_ref,
                 o_ref,
                 k_scr, v_scr, q_scr, merge_scr,
                 *, n_heads, tq, n_valid, compute_dtype, approx_recip):
    t = pl.program_id(1)
    Np, D = x_ref.shape           # padded token count, model dim
    hd = D // n_heads
    cd = compute_dtype

    # ---- once per batch element (t == 0): LN1 + K/V projection for ALL tokens ----
    @pl.when(t == 0)
    def _():
        x_all = x_ref[...].astype(jnp.float32)                                # (Np, D)
        xn = _layernorm(x_all, g1_ref[...], b1_ref[...])
        kv = jnp.dot(xn.astype(cd), wkv_ref[...],
                     preferred_element_type=jnp.float32) + bkv_ref[...]       # (Np, 2D) f32
        for h in range(n_heads):
            k_scr[h] = kv[:, h * hd:(h + 1) * hd].astype(cd)
            v_scr[h] = kv[:, D + h * hd:D + (h + 1) * hd].astype(cd)

    # ---- per query-token tile: LN1 + Q projection only for this tile ----
    row0 = pl.multiple_of(t * tq, tq)
    x_tile = x_ref[pl.ds(row0, tq), :].astype(jnp.float32)                    # (tq, D)
    xn_t = _layernorm(x_tile, g1_ref[...], b1_ref[...])
    # wq / bq are pre-scaled by 1/sqrt(head_dim) on the host -> no in-kernel scale.
    qt = jnp.dot(xn_t.astype(cd), wq_ref[...],
                 preferred_element_type=jnp.float32) + bq_ref[...]            # (tq, D) f32
    for h in range(n_heads):
        q_scr[h] = qt[:, h * hd:(h + 1) * hd].astype(cd)

    q = q_scr[...]                                                            # (H, tq, hd)
    k = k_scr[...]                                                            # (H, Np, hd)
    v = v_scr[...]                                                            # (H, Np, hd)

    # Head-batched attention (one MXU-batched matmul over all heads).
    s = jnp.einsum("hqd,hkd->hqk", q, k,
                   preferred_element_type=jnp.float32)                        # (H, tq, Np)
    if n_valid < Np:                                                          # padded keys -> mask
        col = jax.lax.broadcasted_iota(jnp.int32, s.shape, 2)
        s = jnp.where(col < n_valid, s, -1e30)
    s = s - jnp.max(s, axis=-1, keepdims=True)
    p = jnp.exp(s)
    denom = jnp.sum(p, axis=-1, keepdims=True)
    # Normalise AFTER the PV matmul: H*tq*hd multiplies instead of H*tq*Np.
    o = jnp.einsum("hqk,hkd->hqd", p.astype(cd), v,
                   preferred_element_type=jnp.float32)                        # (H, tq, hd)
    o = o * pl.reciprocal(denom, approx=approx_recip)                         # EUP, no divide

    # Merge heads into a lane-dense (tq, D) compute-dtype buffer (no concatenate).
    for h in range(n_heads):
        merge_scr[:, h * hd:(h + 1) * hd] = o[h].astype(cd)

    attn = jnp.dot(merge_scr[...], wproj_ref[...],
                   preferred_element_type=jnp.float32) + bproj_ref[...]       # (tq, D) f32

    x1 = x_tile + attn                                                        # residual 1

    # ---- MLP branch on the tile ----
    xn2 = _layernorm(x1, g2_ref[...], b2_ref[...])
    h1 = jnp.dot(xn2.astype(cd), w1_ref[...],
                 preferred_element_type=jnp.float32) + bf1_ref[...]           # (tq, hidden)
    h1 = 0.5 * h1 * (1.0 + jax.lax.erf(h1 * _INV_SQRT2))                      # exact GELU
    h2 = jnp.dot(h1.astype(cd), w2_ref[...],
                 preferred_element_type=jnp.float32) + bf2_ref[...]           # (tq, D)

    o_ref[...] = (x1 + h2).astype(o_ref.dtype)                                # residual 2


def vit_block(x, params, n_heads, *, token_tile=None, compute_dtype=jnp.bfloat16):
    B, N, D = x.shape
    if D % n_heads != 0:
        raise ValueError("dim must be divisible by n_heads")
    hd = D // n_heads
    hidden = params["w1"].shape[1]
    scale = float(hd) ** -0.5

    # Chip VMEM capacity (per-generation clamp: 64 MiB on v7x, 128 MiB on v5e/v6e).
    try:
        vmem_cap = int(pltpu.get_tpu_info().vmem_capacity_bytes)
    except Exception:
        vmem_cap = 64 * 1024 * 1024   # conservative fallback

    # Token-tile selection: cap at 128 on small-VMEM chips (v7x), 256 otherwise.
    if token_tile is None:
        token_tile = 128 if vmem_cap <= 64 * 1024 * 1024 else 256
    tq = max(8, min(int(token_tile), _round_up(N, 8)))
    if tq % 8 != 0:
        raise ValueError("token_tile must be a multiple of 8")

    # Pad the token dimension to a multiple of the tile (e.g. ViT N=197 -> 256); padded
    # keys are masked out of the softmax inside the kernel and padded rows cropped after.
    Np = _round_up(N, tq)
    num_tiles = Np // tq
    x_in = jnp.pad(x, ((0, 0), (0, Np - N), (0, 0))) if Np != N else x

    # Host-side parameter prep: split wqkv into Q and KV halves, fold 1/sqrt(hd) into the
    # Q weight/bias (free, one-time), cast matmul weights to compute_dtype (bf16 MXU
    # operands, f32 accumulation); biases / LN affine params stay f32.
    cd = compute_dtype
    wqkv, bqkv = params["wqkv"], params["bqkv"]
    param_list = [
        params["g1"], params["b1"],
        (wqkv[:, :D] * scale).astype(cd), bqkv[:, :D] * scale,        # wq (pre-scaled), bq
        wqkv[:, D:].astype(cd), bqkv[:, D:],                          # wkv, bkv
        params["wproj"].astype(cd), params["bproj"],
        params["g2"], params["b2"],
        params["w1"].astype(cd), params["bf1"],
        params["w2"].astype(cd), params["bf2"],
    ]

    kernel = functools.partial(
        block_kernel,
        n_heads=n_heads, tq=tq, n_valid=N, compute_dtype=cd,
        approx_recip=(jnp.dtype(cd) != jnp.dtype(jnp.float32)))

    # x: full (padded) token range per batch element, DMA'd once per batch step.
    # Params: whole-array VMEM residents (memory_space=VMEM, no blocking) -> loaded once,
    # single-buffered (no 2x pipeline duplication of the weight footprint).
    in_specs = [pl.BlockSpec((None, Np, D), lambda b, t: (b, 0, 0))]
    in_specs += [pl.BlockSpec(memory_space=pltpu.MemorySpace.VMEM)] * len(param_list)
    out_spec = pl.BlockSpec((None, tq, D), lambda b, t: (b, t, 0))     # lane-dense output

    # VMEM working-set estimate: single-buffered params, double-buffered pipelined x/out,
    # lane-padded per-head scratch, and the larger of the t==0 / per-tile f32 live sets.
    lane = 128
    cd_b = jnp.dtype(cd).itemsize
    x_b = x.dtype.itemsize
    hd_pad, d_pad = _round_up(hd, lane), _round_up(D, lane)
    hid_pad, np_pad = _round_up(hidden, lane), _round_up(Np, lane)
    param_bytes = sum(int(p.size) * p.dtype.itemsize for p in param_list)
    io_bytes = 2 * (Np * d_pad + tq * d_pad) * x_b
    scr_bytes = (2 * n_heads * Np * hd_pad + n_heads * tq * hd_pad + tq * d_pad) * cd_b
    live_t0 = (Np * d_pad + Np * _round_up(2 * D, lane)) * 4
    live_tile = (2 * n_heads * tq * np_pad + n_heads * tq * hd_pad
                 + tq * hid_pad + 6 * tq * d_pad) * 4
    est = param_bytes + io_bytes + scr_bytes + max(live_t0, live_tile) + (4 << 20)
    vmem_limit = int(min(max(est, 32 << 20), vmem_cap - (8 << 20)))

    out = pl.pallas_call(
        kernel,
        out_shape=jax.ShapeDtypeStruct((B, Np, D), x.dtype),
        grid_spec=pltpu.PrefetchScalarGridSpec(
            num_scalar_prefetch=0,
            grid=(B, num_tiles),
            in_specs=in_specs,
            out_specs=out_spec,
            scratch_shapes=[
                pltpu.VMEM((n_heads, Np, hd), cd),   # K  (per head, full sequence)
                pltpu.VMEM((n_heads, Np, hd), cd),   # V
                pltpu.VMEM((n_heads, tq, hd), cd),   # Q  (per tile only)
                pltpu.VMEM((tq, D), cd),             # head-merge buffer (compute dtype)
            ]),
        compiler_params=pltpu.CompilerParams(
            dimension_semantics=("parallel", "arbitrary"),
            vmem_limit_bytes=vmem_limit),
    )(x_in, *param_list)

    return out[:, :N, :] if Np != N else out


def ref_block(x, p, n_heads):
    """Pure-JAX reference mirroring the PyTorch forward exactly (f32)."""
    def ln(v, g, b):
        mu = v.mean(-1, keepdims=True)
        var = ((v - mu) ** 2).mean(-1, keepdims=True)
        return (v - mu) / jnp.sqrt(var + 1e-6) * g + b

    B, N, D = x.shape
    hd = D // n_heads
    xn = ln(x, p["g1"][0], p["b1"][0])
    qkv = xn @ p["wqkv"] + p["bqkv"][0]
    qkv = qkv.reshape(B, N, 3, n_heads, hd).transpose(2, 0, 3, 1, 4)
    q, k, v = qkv[0], qkv[1], qkv[2]
    s = jnp.einsum("bhqd,bhkd->bhqk", q, k) * (hd ** -0.5)
    a = jax.nn.softmax(s, axis=-1)
    o = jnp.einsum("bhqk,bhkd->bhqd", a, v).transpose(0, 2, 1, 3).reshape(B, N, D)
    o = o @ p["wproj"] + p["bproj"][0]
    x1 = x + o
    xn2 = ln(x1, p["g2"][0], p["b2"][0])
    h = xn2 @ p["w1"] + p["bf1"][0]
    h = 0.5 * h * (1.0 + jax.lax.erf(h / jnp.sqrt(2.0)))
    h = h @ p["w2"] + p["bf2"][0]
    return x1 + h


if __name__ == "__main__":
    # Small but lane-friendly shapes: batch=2, tokens=32, dim=128 (multiple of 128),
    # heads=4 (head_dim=32), mlp_ratio=4 -> hidden=512.  token_tile=16 -> 2 tiles/batch.
    B, N, D, n_heads = 2, 32, 128, 4
    H = int(D * 4.0)

    key = jax.random.PRNGKey(0)
    ks = jax.random.split(key, 12)

    params = {
        "g1":    jnp.ones((1, D), jnp.float32),
        "b1":    jnp.zeros((1, D), jnp.float32),
        "wqkv":  jax.random.normal(ks[0], (D, 3 * D), jnp.float32) * 0.05,
        "bqkv":  jax.random.normal(ks[1], (1, 3 * D), jnp.float32) * 0.05,
        "wproj": jax.random.normal(ks[2], (D, D), jnp.float32) * 0.05,
        "bproj": jax.random.normal(ks[3], (1, D), jnp.float32) * 0.05,
        "g2":    1.0 + 0.1 * jax.random.normal(ks[4], (1, D), jnp.float32),
        "b2":    0.1 * jax.random.normal(ks[5], (1, D), jnp.float32),
        "w1":    jax.random.normal(ks[6], (D, H), jnp.float32) * 0.05,
        "bf1":   jax.random.normal(ks[7], (1, H), jnp.float32) * 0.05,
        "w2":    jax.random.normal(ks[8], (H, D), jnp.float32) * 0.05,
        "bf2":   jax.random.normal(ks[9], (1, D), jnp.float32) * 0.05,
    }

    x = jax.random.normal(ks[10], (B, N, D), jnp.float32)
    ref = ref_block(x, params, n_heads)

    # Exact-precision path (f32 MXU operands, exact reciprocal): tight match.
    out_f32 = vit_block(x, params, n_heads, token_tile=16, compute_dtype=jnp.float32)
    jax.block_until_ready(out_f32)
    assert out_f32.shape == (B, N, D)
    err_f32 = float(jnp.max(jnp.abs(out_f32 - ref)))
    assert jnp.allclose(out_f32, ref, atol=1e-3, rtol=1e-3), f"f32 max abs err = {err_f32}"

    # Fast path (bf16 MXU operands, f32 accumulation / statistics).
    out_bf16 = vit_block(x, params, n_heads, token_tile=16, compute_dtype=jnp.bfloat16)
    jax.block_until_ready(out_bf16)
    err_bf16 = float(jnp.max(jnp.abs(out_bf16 - ref)))
    assert jnp.allclose(out_bf16, ref, atol=5e-2, rtol=5e-2), f"bf16 max abs err = {err_bf16}"

    # Padded / masked path: N not divisible by the tile (wrapper pads tokens and masks
    # padded keys inside the kernel, mirrors ViT's N=197 case).
    x24 = x[:, :24, :]
    ref24 = ref_block(x24, params, n_heads)
    out24 = vit_block(x24, params, n_heads, token_tile=16, compute_dtype=jnp.float32)
    jax.block_until_ready(out24)
    assert out24.shape == (B, 24, D)
    err24 = float(jnp.max(jnp.abs(out24 - ref24)))
    assert jnp.allclose(out24, ref24, atol=1e-3, rtol=1e-3), f"padded f32 max abs err = {err24}"

    print("KERNEL_OK")
</pallas_src>

<mosaic_0001>
module attributes {stable_mosaic.version = 11 : i64} {
  func.func @block_kernel(%arg0: i32, %arg1: i32, %arg2: memref<1x32x128xf32, #tpu.memory_space<vmem>>, %arg3: memref<1x128xf32, #tpu.memory_space<vmem>>, %arg4: memref<1x128xf32, #tpu.memory_space<vmem>>, %arg5: memref<128x128xf32, #tpu.memory_space<vmem>>, %arg6: memref<1x128xf32, #tpu.memory_space<vmem>>, %arg7: memref<128x256xf32, #tpu.memory_space<vmem>>, %arg8: memref<1x256xf32, #tpu.memory_space<vmem>>, %arg9: memref<128x128xf32, #tpu.memory_space<vmem>>, %arg10: memref<1x128xf32, #tpu.memory_space<vmem>>, %arg11: memref<1x128xf32, #tpu.memory_space<vmem>>, %arg12: memref<1x128xf32, #tpu.memory_space<vmem>>, %arg13: memref<128x512xf32, #tpu.memory_space<vmem>>, %arg14: memref<1x512xf32, #tpu.memory_space<vmem>>, %arg15: memref<512x128xf32, #tpu.memory_space<vmem>>, %arg16: memref<1x128xf32, #tpu.memory_space<vmem>>, %arg17: memref<1x16x128xf32, #tpu.memory_space<vmem>>, %arg18: memref<4x32x32xf32, #tpu.memory_space<vmem>>, %arg19: memref<4x32x32xf32, #tpu.memory_space<vmem>>, %arg20: memref<4x16x32xf32, #tpu.memory_space<vmem>>, %arg21: memref<16x128xf32, #tpu.memory_space<vmem>>) attributes {dimension_semantics = [#tpu.dimension_semantics<parallel>, #tpu.dimension_semantics<arbitrary>], iteration_bounds = array<i64: 2, 2>, scalar_prefetch = 0 : i64, scratch_operands = 4 : i64, tpu.core_type = #tpu.core_type<tc>, window_params = [{transform_indices = @transform_0, window_bounds = array<i64: 1, 32, 128>}, {pipeline_mode = #tpu.pipeline_mode<synchronous>, transform_indices = @transform_1, window_bounds = array<i64: 1, 128>}, {pipeline_mode = #tpu.pipeline_mode<synchronous>, transform_indices = @transform_2, window_bounds = array<i64: 1, 128>}, {pipeline_mode = #tpu.pipeline_mode<synchronous>, transform_indices = @transform_3, window_bounds = array<i64: 128, 128>}, {pipeline_mode = #tpu.pipeline_mode<synchronous>, transform_indices = @transform_4, window_bounds = array<i64: 1, 128>}, {pipeline_mode = #tpu.pipeline_mode<synchronous>, transform_indices = @transform_5, window_bounds = array<i64: 128, 256>}, {pipeline_mode = #tpu.pipeline_mode<synchronous>, transform_indices = @transform_6, window_bounds = array<i64: 1, 256>}, {pipeline_mode = #tpu.pipeline_mode<synchronous>, transform_indices = @transform_7, window_bounds = array<i64: 128, 128>}, {pipeline_mode = #tpu.pipeline_mode<synchronous>, transform_indices = @transform_8, window_bounds = array<i64: 1, 128>}, {pipeline_mode = #tpu.pipeline_mode<synchronous>, transform_indices = @transform_9, window_bounds = array<i64: 1, 128>}, {pipeline_mode = #tpu.pipeline_mode<synchronous>, transform_indices = @transform_10, window_bounds = array<i64: 1, 128>}, {pipeline_mode = #tpu.pipeline_mode<synchronous>, transform_indices = @transform_11, window_bounds = array<i64: 128, 512>}, {pipeline_mode = #tpu.pipeline_mode<synchronous>, transform_indices = @transform_12, window_bounds = array<i64: 1, 512>}, {pipeline_mode = #tpu.pipeline_mode<synchronous>, transform_indices = @transform_13, window_bounds = array<i64: 512, 128>}, {pipeline_mode = #tpu.pipeline_mode<synchronous>, transform_indices = @transform_14, window_bounds = array<i64: 1, 128>}, {transform_indices = @transform_15, window_bounds = array<i64: 1, 16, 128>}]} {
    %c0_i32 = arith.constant 0 : i32
    %0 = arith.cmpi eq, %arg1, %c0_i32 : i32
    %1 = arith.extui %0 : i1 to i32
    %c0_i32_0 = arith.constant 0 : i32
    %2 = arith.cmpi ne, %1, %c0_i32_0 : i32
    scf.if %2 {
      %c0_74 = arith.constant 0 : index
      %c0_75 = arith.constant 0 : index
      %c0_76 = arith.constant 0 : index
      %133 = vector.load %arg2[%c0_74, %c0_75, %c0_76] : memref<1x32x128xf32, #tpu.memory_space<vmem>>, vector<1x32x128xf32>
      %134 = vector.shape_cast %133 : vector<1x32x128xf32> to vector<32x128xf32>
      %c0_77 = arith.constant 0 : index
      %c0_78 = arith.constant 0 : index
      %135 = vector.load %arg3[%c0_77, %c0_78] : memref<1x128xf32, #tpu.memory_space<vmem>>, vector<1x128xf32>
      %c0_79 = arith.constant 0 : index
      %c0_80 = arith.constant 0 : index
      %136 = vector.load %arg4[%c0_79, %c0_80] : memref<1x128xf32, #tpu.memory_space<vmem>>, vector<1x128xf32>
      %cst_81 = arith.constant dense<0.000000e+00> : vector<32xf32>
      %137 = vector.multi_reduction <add>, %134, %cst_81 [1] : vector<32x128xf32> to vector<32xf32>
      %138 = vector.shape_cast %137 : vector<32xf32> to vector<32x1xf32>
      %cst_82 = arith.constant 1.280000e+02 : f32
      %139 = vector.broadcast %cst_82 : f32 to vector<32x1xf32>
      %140 = arith.divf %138, %139 : vector<32x1xf32>
      %141 = vector.broadcast %140 : vector<32x1xf32> to vector<32x128xf32>
      %142 = arith.subf %134, %141 : vector<32x128xf32>
      %143 = arith.mulf %142, %142 : vector<32x128xf32>
      %cst_83 = arith.constant dense<0.000000e+00> : vector<32xf32>
      %144 = vector.multi_reduction <add>, %143, %cst_83 [1] : vector<32x128xf32> to vector<32xf32>
      %145 = vector.shape_cast %144 : vector<32xf32> to vector<32x1xf32>
      %cst_84 = arith.constant 1.280000e+02 : f32
      %146 = vector.broadcast %cst_84 : f32 to vector<32x1xf32>
      %147 = arith.divf %145, %146 : vector<32x1xf32>
      %148 = vector.broadcast %140 : vector<32x1xf32> to vector<32x128xf32>
      %149 = arith.subf %134, %148 : vector<32x128xf32>
      %cst_85 = arith.constant 9.99999997E-7 : f32
      %150 = vector.broadcast %cst_85 : f32 to vector<32x1xf32>
      %151 = arith.addf %147, %150 : vector<32x1xf32>
      %152 = math.rsqrt %151 : vector<32x1xf32>
      %153 = vector.broadcast %152 : vector<32x1xf32> to vector<32x128xf32>
      %154 = arith.mulf %149, %153 : vector<32x128xf32>
      %155 = vector.broadcast %135 : vector<1x128xf32> to vector<32x128xf32>
      %156 = arith.mulf %154, %155 : vector<32x128xf32>
      %157 = vector.broadcast %136 : vector<1x128xf32> to vector<32x128xf32>
      %158 = arith.addf %156, %157 : vector<32x128xf32>
      %c0_86 = arith.constant 0 : index
      %c0_87 = arith.constant 0 : index
      %159 = vector.load %arg7[%c0_86, %c0_87] : memref<128x256xf32, #tpu.memory_space<vmem>>, vector<128x256xf32>
      %cst_88 = arith.constant dense<0.000000e+00> : vector<32x256xf32>
      %160 = tpu.matmul %158, %159, %cst_88 {dimension_numbers = #tpu.dot_dimension_numbers<[1], [0], [0], [1], [0, 0, 1, 1], [], []>} : vector<32x128xf32>, vector<128x256xf32>, vector<32x256xf32> -> vector<32x256xf32>
      %c0_89 = arith.constant 0 : index
      %c0_90 = arith.constant 0 : index
      %161 = vector.load %arg8[%c0_89, %c0_90] : memref<1x256xf32, #tpu.memory_space<vmem>>, vector<1x256xf32>
      %162 = vector.broadcast %161 : vector<1x256xf32> to vector<32x256xf32>
      %163 = arith.addf %160, %162 : vector<32x256xf32>
      %164 = vector.extract_strided_slice %163 {offsets = [0, 0], sizes = [32, 32], strides = [1, 1]} : vector<32x256xf32> to vector<32x32xf32>
      %c0_91 = arith.constant 0 : index
      %c0_92 = arith.constant 0 : index
      %c0_93 = arith.constant 0 : index
      %165 = vector.load %arg18[%c0_91, %c0_92, %c0_93] : memref<4x32x32xf32, #tpu.memory_space<vmem>>, vector<1x32x32xf32>
      %166 = vector.shape_cast %165 : vector<1x32x32xf32> to vector<32x32xf32>
      %167 = vector.shape_cast %164 : vector<32x32xf32> to vector<1x32x32xf32>
      tpu.vector_store %arg18[%c0_91, %c0_92, %c0_93], %167 {strides = array<i32>} : memref<4x32x32xf32, #tpu.memory_space<vmem>>, vector<1x32x32xf32>,
      %168 = vector.extract_strided_slice %163 {offsets = [0, 128], sizes = [32, 32], strides = [1, 1]} : vector<32x256xf32> to vector<32x32xf32>
      %c0_94 = arith.constant 0 : index
      %c0_95 = arith.constant 0 : index
      %c0_96 = arith.constant 0 : index
      %169 = vector.load %arg19[%c0_94, %c0_95, %c0_96] : memref<4x32x32xf32, #tpu.memory_space<vmem>>, vector<1x32x32xf32>
      %170 = vector.shape_cast %169 : vector<1x32x32xf32> to vector<32x32xf32>
      %171 = vector.shape_cast %168 : vector<32x32xf32> to vector<1x32x32xf32>
      tpu.vector_store %arg19[%c0_94, %c0_95, %c0_96], %171 {strides = array<i32>} : memref<4x32x32xf32, #tpu.memory_space<vmem>>, vector<1x32x32xf32>,
      %172 = vector.extract_strided_slice %163 {offsets = [0, 32], sizes = [32, 32], strides = [1, 1]} : vector<32x256xf32> to vector<32x32xf32>
      %c1_97 = arith.constant 1 : index
      %c0_98 = arith.constant 0 : index
      %c0_99 = arith.constant 0 : index
      %173 = vector.load %arg18[%c1_97, %c0_98, %c0_99] : memref<4x32x32xf32, #tpu.memory_space<vmem>>, vector<1x32x32xf32>
      %174 = vector.shape_cast %173 : vector<1x32x32xf32> to vector<32x32xf32>
      %175 = vector.shape_cast %172 : vector<32x32xf32> to vector<1x32x32xf32>
      tpu.vector_store %arg18[%c1_97, %c0_98, %c0_99], %175 {strides = array<i32>} : memref<4x32x32xf32, #tpu.memory_space<vmem>>, vector<1x32x32xf32>,
      %176 = vector.extract_strided_slice %163 {offsets = [0, 160], sizes = [32, 32], strides = [1, 1]} : vector<32x256xf32> to vector<32x32xf32>
      %c1_100 = arith.constant 1 : index
      %c0_101 = arith.constant 0 : index
      %c0_102 = arith.constant 0 : index
      %177 = vector.load %arg19[%c1_100, %c0_101, %c0_102] : memref<4x32x32xf32, #tpu.memory_space<vmem>>, vector<1x32x32xf32>
      %178 = vector.shape_cast %177 : vector<1x32x32xf32> to vector<32x32xf32>
      %179 = vector.shape_cast %176 : vector<32x32xf32> to vector<1x32x32xf32>
      tpu.vector_store %arg19[%c1_100, %c0_101, %c0_102], %179 {strides = array<i32>} : memref<4x32x32xf32, #tpu.memory_space<vmem>>, vector<1x32x32xf32>,
      %180 = vector.extract_strided_slice %163 {offsets = [0, 64], sizes = [32, 32], strides = [1, 1]} : vector<32x256xf32> to vector<32x32xf32>
      %c2_103 = arith.constant 2 : index
      %c0_104 = arith.constant 0 : index
      %c0_105 = arith.constant 0 : index
      %181 = vector.load %arg18[%c2_103, %c0_104, %c0_105] : memref<4x32x32xf32, #tpu.memory_space<vmem>>, vector<1x32x32xf32>
      %182 = vector.shape_cast %181 : vector<1x32x32xf32> to vector<32x32xf32>
      %183 = vector.shape_cast %180 : vector<32x32xf32> to vector<1x32x32xf32>
      tpu.vector_store %arg18[%c2_103, %c0_104, %c0_105], %183 {strides = array<i32>} : memref<4x32x32xf32, #tpu.memory_space<vmem>>, vector<1x32x32xf32>,
      %184 = vector.extract_strided_slice %163 {offsets = [0, 192], sizes = [32, 32], strides = [1, 1]} : vector<32x256xf32> to vector<32x32xf32>
      %c2_106 = arith.constant 2 : index
      %c0_107 = arith.constant 0 : index
      %c0_108 = arith.constant 0 : index
      %185 = vector.load %arg19[%c2_106, %c0_107, %c0_108] : memref<4x32x32xf32, #tpu.memory_space<vmem>>, vector<1x32x32xf32>
      %186 = vector.shape_cast %185 : vector<1x32x32xf32> to vector<32x32xf32>
      %187 = vector.shape_cast %184 : vector<32x32xf32> to vector<1x32x32xf32>
      tpu.vector_store %arg19[%c2_106, %c0_107, %c0_108], %187 {strides = array<i32>} : memref<4x32x32xf32, #tpu.memory_space<vmem>>, vector<1x32x32xf32>,
      %188 = vector.extract_strided_slice %163 {offsets = [0, 96], sizes = [32, 32], strides = [1, 1]} : vector<32x256xf32> to vector<32x32xf32>
      %c3_109 = arith.constant 3 : index
      %c0_110 = arith.constant 0 : index
      %c0_111 = arith.constant 0 : index
      %189 = vector.load %arg18[%c3_109, %c0_110, %c0_111] : memref<4x32x32xf32, #tpu.memory_space<vmem>>, vector<1x32x32xf32>
      %190 = vector.shape_cast %189 : vector<1x32x32xf32> to vector<32x32xf32>
      %191 = vector.shape_cast %188 : vector<32x32xf32> to vector<1x32x32xf32>
      tpu.vector_store %arg18[%c3_109, %c0_110, %c0_111], %191 {strides = array<i32>} : memref<4x32x32xf32, #tpu.memory_space<vmem>>, vector<1x32x32xf32>,
      %192 = vector.extract_strided_slice %163 {offsets = [0, 224], sizes = [32, 32], strides = [1, 1]} : vector<32x256xf32> to vector<32x32xf32>
      %c3_112 = arith.constant 3 : index
      %c0_113 = arith.constant 0 : index
      %c0_114 = arith.constant 0 : index
      %193 = vector.load %arg19[%c3_112, %c0_113, %c0_114] : memref<4x32x32xf32, #tpu.memory_space<vmem>>, vector<1x32x32xf32>
      %194 = vector.shape_cast %193 : vector<1x32x32xf32> to vector<32x32xf32>
      %195 = vector.shape_cast %192 : vector<32x32xf32> to vector<1x32x32xf32>
      tpu.vector_store %arg19[%c3_112, %c0_113, %c0_114], %195 {strides = array<i32>} : memref<4x32x32xf32, #tpu.memory_space<vmem>>, vector<1x32x32xf32>,
    } else {
    }
    %c16_i32 = arith.constant 16 : i32
    %3 = arith.muli %arg1, %c16_i32 : i32
    %4 = tpu.assume_multiple %3, 16 : i32
    %c0 = arith.constant 0 : index
    %5 = arith.index_cast %4 : i32 to index
    %c0_1 = arith.constant 0 : index
    %6 = vector.load %arg2[%c0, %5, %c0_1] : memref<1x32x128xf32, #tpu.memory_space<vmem>>, vector<1x16x128xf32>
    %7 = vector.shape_cast %6 : vector<1x16x128xf32> to vector<16x128xf32>
    %c0_2 = arith.constant 0 : index
    %c0_3 = arith.constant 0 : index
    %8 = vector.load %arg3[%c0_2, %c0_3] : memref<1x128xf32, #tpu.memory_space<vmem>>, vector<1x128xf32>
    %c0_4 = arith.constant 0 : index
    %c0_5 = arith.constant 0 : index
    %9 = vector.load %arg4[%c0_4, %c0_5] : memref<1x128xf32, #tpu.memory_space<vmem>>, vector<1x128xf32>
    %cst = arith.constant dense<0.000000e+00> : vector<16xf32>
    %10 = vector.multi_reduction <add>, %7, %cst [1] : vector<16x128xf32> to vector<16xf32>
    %11 = vector.shape_cast %10 : vector<16xf32> to vector<16x1xf32>
    %cst_6 = arith.constant 1.280000e+02 : f32
    %12 = vector.broadcast %cst_6 : f32 to vector<16x1xf32>
    %13 = arith.divf %11, %12 : vector<16x1xf32>
    %14 = vector.broadcast %13 : vector<16x1xf32> to vector<16x128xf32>
    %15 = arith.subf %7, %14 : vector<16x128xf32>
    %16 = arith.mulf %15, %15 : vector<16x128xf32>
    %cst_7 = arith.constant dense<0.000000e+00> : vector<16xf32>
    %17 = vector.multi_reduction <add>, %16, %cst_7 [1] : vector<16x128xf32> to vector<16xf32>
    %18 = vector.shape_cast %17 : vector<16xf32> to vector<16x1xf32>
    %cst_8 = arith.constant 1.280000e+02 : f32
    %19 = vector.broadcast %cst_8 : f32 to vector<16x1xf32>
    %20 = arith.divf %18, %19 : vector<16x1xf32>
    %21 = vector.broadcast %13 : vector<16x1xf32> to vector<16x128xf32>
    %22 = arith.subf %7, %21 : vector<16x128xf32>
    %cst_9 = arith.constant 9.99999997E-7 : f32
    %23 = vector.broadcast %cst_9 : f32 to vector<16x1xf32>
    %24 = arith.addf %20, %23 : vector<16x1xf32>
    %25 = math.rsqrt %24 : vector<16x1xf32>
    %26 = vector.broadcast %25 : vector<16x1xf32> to vector<16x128xf32>
    %27 = arith.mulf %22, %26 : vector<16x128xf32>
    %28 = vector.broadcast %8 : vector<1x128xf32> to vector<16x128xf32>
    %29 = arith.mulf %27, %28 : vector<16x128xf32>
    %30 = vector.broadcast %9 : vector<1x128xf32> to vector<16x128xf32>
    %31 = arith.addf %29, %30 : vector<16x128xf32>
    %c0_10 = arith.constant 0 : index
    %c0_11 = arith.constant 0 : index
    %32 = vector.load %arg5[%c0_10, %c0_11] : memref<128x128xf32, #tpu.memory_space<vmem>>, vector<128x128xf32>
    %cst_12 = arith.constant dense<0.000000e+00> : vector<16x128xf32>
    %33 = tpu.matmul %31, %32, %cst_12 {dimension_numbers = #tpu.dot_dimension_numbers<[1], [0], [0], [1], [0, 0, 1, 1], [], []>} : vector<16x128xf32>, vector<128x128xf32>, vector<16x128xf32> -> vector<16x128xf32>
    %c0_13 = arith.constant 0 : index
    %c0_14 = arith.constant 0 : index
    %34 = vector.load %arg6[%c0_13, %c0_14] : memref<1x128xf32, #tpu.memory_space<vmem>>, vector<1x128xf32>
    %35 = vector.broadcast %34 : vector<1x128xf32> to vector<16x128xf32>
    %36 = arith.addf %33, %35 : vector<16x128xf32>
    %37 = vector.extract_strided_slice %36 {offsets = [0, 0], sizes = [16, 32], strides = [1, 1]} : vector<16x128xf32> to vector<16x32xf32>
    %c0_15 = arith.constant 0 : index
    %c0_16 = arith.constant 0 : index
    %c0_17 = arith.constant 0 : index
    %38 = vector.load %arg20[%c0_15, %c0_16, %c0_17] : memref<4x16x32xf32, #tpu.memory_space<vmem>>, vector<1x16x32xf32>
    %39 = vector.shape_cast %38 : vector<1x16x32xf32> to vector<16x32xf32>
    %40 = vector.shape_cast %37 : vector<16x32xf32> to vector<1x16x32xf32>
    tpu.vector_store %arg20[%c0_15, %c0_16, %c0_17], %40 {strides = array<i32>} : memref<4x16x32xf32, #tpu.memory_space<vmem>>, vector<1x16x32xf32>,
    %41 = vector.extract_strided_slice %36 {offsets = [0, 32], sizes = [16, 32], strides = [1, 1]} : vector<16x128xf32> to vector<16x32xf32>
    %c1 = arith.constant 1 : index
    %c0_18 = arith.constant 0 : index
    %c0_19 = arith.constant 0 : index
    %42 = vector.load %arg20[%c1, %c0_18, %c0_19] : memref<4x16x32xf32, #tpu.memory_space<vmem>>, vector<1x16x32xf32>
    %43 = vector.shape_cast %42 : vector<1x16x32xf32> to vector<16x32xf32>
    %44 = vector.shape_cast %41 : vector<16x32xf32> to vector<1x16x32xf32>
    tpu.vector_store %arg20[%c1, %c0_18, %c0_19], %44 {strides = array<i32>} : memref<4x16x32xf32, #tpu.memory_space<vmem>>, vector<1x16x32xf32>,
    %45 = vector.extract_strided_slice %36 {offsets = [0, 64], sizes = [16, 32], strides = [1, 1]} : vector<16x128xf32> to vector<16x32xf32>
    %c2 = arith.constant 2 : index
    %c0_20 = arith.constant 0 : index
    %c0_21 = arith.constant 0 : index
    %46 = vector.load %arg20[%c2, %c0_20, %c0_21] : memref<4x16x32xf32, #tpu.memory_space<vmem>>, vector<1x16x32xf32>
    %47 = vector.shape_cast %46 : vector<1x16x32xf32> to vector<16x32xf32>
    %48 = vector.shape_cast %45 : vector<16x32xf32> to vector<1x16x32xf32>
    tpu.vector_store %arg20[%c2, %c0_20, %c0_21], %48 {strides = array<i32>} : memref<4x16x32xf32, #tpu.memory_space<vmem>>, vector<1x16x32xf32>,
    %49 = vector.extract_strided_slice %36 {offsets = [0, 96], sizes = [16, 32], strides = [1, 1]} : vector<16x128xf32> to vector<16x32xf32>
    %c3 = arith.constant 3 : index
    %c0_22 = arith.constant 0 : index
    %c0_23 = arith.constant 0 : index
    %50 = vector.load %arg20[%c3, %c0_22, %c0_23] : memref<4x16x32xf32, #tpu.memory_space<vmem>>, vector<1x16x32xf32>
    %51 = vector.shape_cast %50 : vector<1x16x32xf32> to vector<16x32xf32>
    %52 = vector.shape_cast %49 : vector<16x32xf32> to vector<1x16x32xf32>
    tpu.vector_store %arg20[%c3, %c0_22, %c0_23], %52 {strides = array<i32>} : memref<4x16x32xf32, #tpu.memory_space<vmem>>, vector<1x16x32xf32>,
    %c0_24 = arith.constant 0 : index
    %c0_25 = arith.constant 0 : index
    %c0_26 = arith.constant 0 : index
    %53 = vector.load %arg20[%c0_24, %c0_25, %c0_26] : memref<4x16x32xf32, #tpu.memory_space<vmem>>, vector<4x16x32xf32>
    %c0_27 = arith.constant 0 : index
    %c0_28 = arith.constant 0 : index
    %c0_29 = arith.constant 0 : index
    %54 = vector.load %arg18[%c0_27, %c0_28, %c0_29] : memref<4x32x32xf32, #tpu.memory_space<vmem>>, vector<4x32x32xf32>
    %c0_30 = arith.constant 0 : index
    %c0_31 = arith.constant 0 : index
    %c0_32 = arith.constant 0 : index
    %55 = vector.load %arg19[%c0_30, %c0_31, %c0_32] : memref<4x32x32xf32, #tpu.memory_space<vmem>>, vector<4x32x32xf32>
    "tpu.trace_start"() <{level = 10 : i32, message = "hqd,hkd->hqk"}> : () -> ()
    %cst_33 = arith.constant dense<0.000000e+00> : vector<4x16x32xf32>
    %56 = tpu.matmul %53, %54, %cst_33 {dimension_numbers = #tpu.dot_dimension_numbers<[2], [2], [1], [1], [0, 0, 0, 1, 1, 1], [0], [0]>} : vector<4x16x32xf32>, vector<4x32x32xf32>, vector<4x16x32xf32> -> vector<4x16x32xf32>
    "tpu.trace_stop"() : () -> ()
    %cst_34 = arith.constant dense<0xFF800000> : vector<4x16xf32>
    %57 = vector.multi_reduction <maximumf>, %56, %cst_34 [2] : vector<4x16x32xf32> to vector<4x16xf32>
    %58 = vector.shape_cast %57 : vector<4x16xf32> to vector<4x16x1xf32>
    %59 = vector.broadcast %58 : vector<4x16x1xf32> to vector<4x16x32xf32>
    %60 = arith.subf %56, %59 : vector<4x16x32xf32>
    %61 = math.exp %60 : vector<4x16x32xf32>
    %cst_35 = arith.constant dense<0.000000e+00> : vector<4x16xf32>
    %62 = vector.multi_reduction <add>, %61, %cst_35 [2] : vector<4x16x32xf32> to vector<4x16xf32>
    %63 = vector.shape_cast %62 : vector<4x16xf32> to vector<4x16x1xf32>
    "tpu.trace_start"() <{level = 10 : i32, message = "hqk,hkd->hqd"}> : () -> ()
    %cst_36 = arith.constant dense<0.000000e+00> : vector<4x16x32xf32>
    %64 = tpu.matmul %61, %55, %cst_36 {dimension_numbers = #tpu.dot_dimension_numbers<[2], [1], [1], [2], [0, 0, 0, 1, 1, 2], [0], [0]>} : vector<4x16x32xf32>, vector<4x32x32xf32>, vector<4x16x32xf32> -> vector<4x16x32xf32>
    "tpu.trace_stop"() : () -> ()
    %65 = tpu.reciprocal %63 : vector<4x16x1xf32> -> vector<4x16x1xf32>
    %66 = vector.broadcast %65 : vector<4x16x1xf32> to vector<4x16x32xf32>
    %67 = arith.mulf %64, %66 : vector<4x16x32xf32>
    %68 = vector.extract_strided_slice %67 {offsets = [0, 0, 0], sizes = [1, 16, 32], strides = [1, 1, 1]} : vector<4x16x32xf32> to vector<1x16x32xf32>
    %69 = vector.shape_cast %68 : vector<1x16x32xf32> to vector<16x32xf32>
    %c0_37 = arith.constant 0 : index
    %c0_38 = arith.constant 0 : index
    %70 = vector.load %arg21[%c0_37, %c0_38] : memref<16x128xf32, #tpu.memory_space<vmem>>, vector<16x32xf32>
    tpu.vector_store %arg21[%c0_37, %c0_38], %69 {strides = array<i32>} : memref<16x128xf32, #tpu.memory_space<vmem>>, vector<16x32xf32>,
    %71 = vector.extract_strided_slice %67 {offsets = [1, 0, 0], sizes = [1, 16, 32], strides = [1, 1, 1]} : vector<4x16x32xf32> to vector<1x16x32xf32>
    %72 = vector.shape_cast %71 : vector<1x16x32xf32> to vector<16x32xf32>
    %c0_39 = arith.constant 0 : index
    %c32 = arith.constant 32 : index
    %73 = vector.load %arg21[%c0_39, %c32] : memref<16x128xf32, #tpu.memory_space<vmem>>, vector<16x32xf32>
    tpu.vector_store %arg21[%c0_39, %c32], %72 {strides = array<i32>} : memref<16x128xf32, #tpu.memory_space<vmem>>, vector<16x32xf32>,
    %74 = vector.extract_strided_slice %67 {offsets = [2, 0, 0], sizes = [1, 16, 32], strides = [1, 1, 1]} : vector<4x16x32xf32> to vector<1x16x32xf32>
    %75 = vector.shape_cast %74 : vector<1x16x32xf32> to vector<16x32xf32>
    %c0_40 = arith.constant 0 : index
    %c64 = arith.constant 64 : index
    %76 = vector.load %arg21[%c0_40, %c64] : memref<16x128xf32, #tpu.memory_space<vmem>>, vector<16x32xf32>
    tpu.vector_store %arg21[%c0_40, %c64], %75 {strides = array<i32>} : memref<16x128xf32, #tpu.memory_space<vmem>>, vector<16x32xf32>,
    %77 = vector.extract_strided_slice %67 {offsets = [3, 0, 0], sizes = [1, 16, 32], strides = [1, 1, 1]} : vector<4x16x32xf32> to vector<1x16x32xf32>
    %78 = vector.shape_cast %77 : vector<1x16x32xf32> to vector<16x32xf32>
    %c0_41 = arith.constant 0 : index
    %c96 = arith.constant 96 : index
    %79 = vector.load %arg21[%c0_41, %c96] : memref<16x128xf32, #tpu.memory_space<vmem>>, vector<16x32xf32>
    tpu.vector_store %arg21[%c0_41, %c96], %78 {strides = array<i32>} : memref<16x128xf32, #tpu.memory_space<vmem>>, vector<16x32xf32>,
    %c0_42 = arith.constant 0 : index
    %c0_43 = arith.constant 0 : index
    %80 = vector.load %arg21[%c0_42, %c0_43] : memref<16x128xf32, #tpu.memory_space<vmem>>, vector<16x128xf32>
    %c0_44 = arith.constant 0 : index
    %c0_45 = arith.constant 0 : index
    %81 = vector.load %arg9[%c0_44, %c0_45] : memref<128x128xf32, #tpu.memory_space<vmem>>, vector<128x128xf32>
    %cst_46 = arith.constant dense<0.000000e+00> : vector<16x128xf32>
    %82 = tpu.matmul %80, %81, %cst_46 {dimension_numbers = #tpu.dot_dimension_numbers<[1], [0], [0], [1], [0, 0, 1, 1], [], []>} : vector<16x128xf32>, vector<128x128xf32>, vector<16x128xf32> -> vector<16x128xf32>
    %c0_47 = arith.constant 0 : index
    %c0_48 = arith.constant 0 : index
    %83 = vector.load %arg10[%c0_47, %c0_48] : memref<1x128xf32, #tpu.memory_space<vmem>>, vector<1x128xf32>
    %84 = vector.broadcast %83 : vector<1x128xf32> to vector<16x128xf32>
    %85 = arith.addf %82, %84 : vector<16x128xf32>
    %86 = arith.addf %7, %85 : vector<16x128xf32>
    %c0_49 = arith.constant 0 : index
    %c0_50 = arith.constant 0 : index
    %87 = vector.load %arg11[%c0_49, %c0_50] : memref<1x128xf32, #tpu.memory_space<vmem>>, vector<1x128xf32>
    %c0_51 = arith.constant 0 : index
    %c0_52 = arith.constant 0 : index
    %88 = vector.load %arg12[%c0_51, %c0_52] : memref<1x128xf32, #tpu.memory_space<vmem>>, vector<1x128xf32>
    %cst_53 = arith.constant dense<0.000000e+00> : vector<16xf32>
    %89 = vector.multi_reduction <add>, %86, %cst_53 [1] : vector<16x128xf32> to vector<16xf32>
    %90 = vector.shape_cast %89 : vector<16xf32> to vector<16x1xf32>
    %cst_54 = arith.constant 1.280000e+02 : f32
    %91 = vector.broadcast %cst_54 : f32 to vector<16x1xf32>
    %92 = arith.divf %90, %91 : vector<16x1xf32>
    %93 = vector.broadcast %92 : vector<16x1xf32> to vector<16x128xf32>
    %94 = arith.subf %86, %93 : vector<16x128xf32>
    %95 = arith.mulf %94, %94 : vector<16x128xf32>
    %cst_55 = arith.constant dense<0.000000e+00> : vector<16xf32>
    %96 = vector.multi_reduction <add>, %95, %cst_55 [1] : vector<16x128xf32> to vector<16xf32>
    %97 = vector.shape_cast %96 : vector<16xf32> to vector<16x1xf32>
    %cst_56 = arith.constant 1.280000e+02 : f32
    %98 = vector.broadcast %cst_56 : f32 to vector<16x1xf32>
    %99 = arith.divf %97, %98 : vector<16x1xf32>
    %100 = vector.broadcast %92 : vector<16x1xf32> to vector<16x128xf32>
    %101 = arith.subf %86, %100 : vector<16x128xf32>
    %cst_57 = arith.constant 9.99999997E-7 : f32
    %102 = vector.broadcast %cst_57 : f32 to vector<16x1xf32>
    %103 = arith.addf %99, %102 : vector<16x1xf32>
    %104 = math.rsqrt %103 : vector<16x1xf32>
    %105 = vector.broadcast %104 : vector<16x1xf32> to vector<16x128xf32>
    %106 = arith.mulf %101, %105 : vector<16x128xf32>
    %107 = vector.broadcast %87 : vector<1x128xf32> to vector<16x128xf32>
    %108 = arith.mulf %106, %107 : vector<16x128xf32>
    %109 = vector.broadcast %88 : vector<1x128xf32> to vector<16x128xf32>
    %110 = arith.addf %108, %109 : vector<16x128xf32>
    %c0_58 = arith.constant 0 : index
    %c0_59 = arith.constant 0 : index
    %111 = vector.load %arg13[%c0_58, %c0_59] : memref<128x512xf32, #tpu.memory_space<vmem>>, vector<128x512xf32>
    %cst_60 = arith.constant dense<0.000000e+00> : vector<16x512xf32>
    %112 = tpu.matmul %110, %111, %cst_60 {dimension_numbers = #tpu.dot_dimension_numbers<[1], [0], [0], [1], [0, 0, 1, 1], [], []>} : vector<16x128xf32>, vector<128x512xf32>, vector<16x512xf32> -> vector<16x512xf32>
    %c0_61 = arith.constant 0 : index
    %c0_62 = arith.constant 0 : index
    %113 = vector.load %arg14[%c0_61, %c0_62] : memref<1x512xf32, #tpu.memory_space<vmem>>, vector<1x512xf32>
    %114 = vector.broadcast %113 : vector<1x512xf32> to vector<16x512xf32>
    %115 = arith.addf %112, %114 : vector<16x512xf32>
    %cst_63 = arith.constant 5.000000e-01 : f32
    %116 = vector.broadcast %cst_63 : f32 to vector<16x512xf32>
    %117 = arith.mulf %116, %115 : vector<16x512xf32>
    %cst_64 = arith.constant 0.707106769 : f32
    %118 = vector.broadcast %cst_64 : f32 to vector<16x512xf32>
    %119 = arith.mulf %115, %118 : vector<16x512xf32>
    %120 = math.erf %119 : vector<16x512xf32>
    %cst_65 = arith.constant 1.000000e+00 : f32
    %121 = vector.broadcast %cst_65 : f32 to vector<16x512xf32>
    %122 = arith.addf %121, %120 : vector<16x512xf32>
    %123 = arith.mulf %117, %122 : vector<16x512xf32>
    %c0_66 = arith.constant 0 : index
    %c0_67 = arith.constant 0 : index
    %124 = vector.load %arg15[%c0_66, %c0_67] : memref<512x128xf32, #tpu.memory_space<vmem>>, vector<512x128xf32>
    %cst_68 = arith.constant dense<0.000000e+00> : vector<16x128xf32>
    %125 = tpu.matmul %123, %124, %cst_68 {dimension_numbers = #tpu.dot_dimension_numbers<[1], [0], [0], [1], [0, 0, 1, 1], [], []>} : vector<16x512xf32>, vector<512x128xf32>, vector<16x128xf32> -> vector<16x128xf32>
    %c0_69 = arith.constant 0 : index
    %c0_70 = arith.constant 0 : index
    %126 = vector.load %arg16[%c0_69, %c0_70] : memref<1x128xf32, #tpu.memory_space<vmem>>, vector<1x128xf32>
    %127 = vector.broadcast %126 : vector<1x128xf32> to vector<16x128xf32>
    %128 = arith.addf %125, %127 : vector<16x128xf32>
    %129 = arith.addf %86, %128 : vector<16x128xf32>
    %c0_71 = arith.constant 0 : index
    %c0_72 = arith.constant 0 : index
    %c0_73 = arith.constant 0 : index
    %130 = vector.load %arg17[%c0_71, %c0_72, %c0_73] : memref<1x16x128xf32, #tpu.memory_space<vmem>>, vector<1x16x128xf32>
    %131 = vector.shape_cast %130 : vector<1x16x128xf32> to vector<16x128xf32>
    %132 = vector.shape_cast %129 : vector<16x128xf32> to vector<1x16x128xf32>
    tpu.vector_store %arg17[%c0_71, %c0_72, %c0_73], %132 {strides = array<i32>} : memref<1x16x128xf32, #tpu.memory_space<vmem>>, vector<1x16x128xf32>,
    return
  }
  func.func @transform_0(%arg0: i32, %arg1: i32) -> (i32, i32, i32) {
    %c0_i32 = arith.constant 0 : i32
    %c0_i32_0 = arith.constant 0 : i32
    %c0_i32_1 = arith.constant 0 : i32
    return %arg0, %c0_i32, %c0_i32_0 : i32, i32, i32
  }
  func.func @transform_1(%arg0: i32, %arg1: i32) -> (i32, i32) {
    %c0_i32 = arith.constant 0 : i32
    %c0_i32_0 = arith.constant 0 : i32
    %c0_i32_1 = arith.constant 0 : i32
    return %c0_i32, %c0_i32_0 : i32, i32
  }
  func.func @transform_2(%arg0: i32, %arg1: i32) -> (i32, i32) {
    %c0_i32 = arith.constant 0 : i32
    %c0_i32_0 = arith.constant 0 : i32
    %c0_i32_1 = arith.constant 0 : i32
    return %c0_i32, %c0_i32_0 : i32, i32
  }
  func.func @transform_3(%arg0: i32, %arg1: i32) -> (i32, i32) {
    %c0_i32 = arith.constant 0 : i32
    %c0_i32_0 = arith.constant 0 : i32
    %c0_i32_1 = arith.constant 0 : i32
    return %c0_i32, %c0_i32_0 : i32, i32
  }
  func.func @transform_4(%arg0: i32, %arg1: i32) -> (i32, i32) {
    %c0_i32 = arith.constant 0 : i32
    %c0_i32_0 = arith.constant 0 : i32
    %c0_i32_1 = arith.constant 0 : i32
    return %c0_i32, %c0_i32_0 : i32, i32
  }
  func.func @transform_5(%arg0: i32, %arg1: i32) -> (i32, i32) {
    %c0_i32 = arith.constant 0 : i32
    %c0_i32_0 = arith.constant 0 : i32
    %c0_i32_1 = arith.constant 0 : i32
    return %c0_i32, %c0_i32_0 : i32, i32
  }
  func.func @transform_6(%arg0: i32, %arg1: i32) -> (i32, i32) {
    %c0_i32 = arith.constant 0 : i32
    %c0_i32_0 = arith.constant 0 : i32
    %c0_i32_1 = arith.constant 0 : i32
    return %c0_i32, %c0_i32_0 : i32, i32
  }
  func.func @transform_7(%arg0: i32, %arg1: i32) -> (i32, i32) {
    %c0_i32 = arith.constant 0 : i32
    %c0_i32_0 = arith.constant 0 : i32
    %c0_i32_1 = arith.constant 0 : i32
    return %c0_i32, %c0_i32_0 : i32, i32
  }
  func.func @transform_8(%arg0: i32, %arg1: i32) -> (i32, i32) {
    %c0_i32 = arith.constant 0 : i32
    %c0_i32_0 = arith.constant 0 : i32
    %c0_i32_1 = arith.constant 0 : i32
    return %c0_i32, %c0_i32_0 : i32, i32
  }
  func.func @transform_9(%arg0: i32, %arg1: i32) -> (i32, i32) {
    %c0_i32 = arith.constant 0 : i32
    %c0_i32_0 = arith.constant 0 : i32
    %c0_i32_1 = arith.constant 0 : i32
    return %c0_i32, %c0_i32_0 : i32, i32
  }
  func.func @transform_10(%arg0: i32, %arg1: i32) -> (i32, i32) {
    %c0_i32 = arith.constant 0 : i32
    %c0_i32_0 = arith.constant 0 : i32
    %c0_i32_1 = arith.constant 0 : i32
    return %c0_i32, %c0_i32_0 : i32, i32
  }
  func.func @transform_11(%arg0: i32, %arg1: i32) -> (i32, i32) {
    %c0_i32 = arith.constant 0 : i32
    %c0_i32_0 = arith.constant 0 : i32
    %c0_i32_1 = arith.constant 0 : i32
    return %c0_i32, %c0_i32_0 : i32, i32
  }
  func.func @transform_12(%arg0: i32, %arg1: i32) -> (i32, i32) {
    %c0_i32 = arith.constant 0 : i32
    %c0_i32_0 = arith.constant 0 : i32
    %c0_i32_1 = arith.constant 0 : i32
    return %c0_i32, %c0_i32_0 : i32, i32
  }
  func.func @transform_13(%arg0: i32, %arg1: i32) -> (i32, i32) {
    %c0_i32 = arith.constant 0 : i32
    %c0_i32_0 = arith.constant 0 : i32
    %c0_i32_1 = arith.constant 0 : i32
    return %c0_i32, %c0_i32_0 : i32, i32
  }
  func.func @transform_14(%arg0: i32, %arg1: i32) -> (i32, i32) {
    %c0_i32 = arith.constant 0 : i32
    %c0_i32_0 = arith.constant 0 : i32
    %c0_i32_1 = arith.constant 0 : i32
    return %c0_i32, %c0_i32_0 : i32, i32
  }
  func.func @transform_15(%arg0: i32, %arg1: i32) -> (i32, i32, i32) {
    %c0_i32 = arith.constant 0 : i32
    %c0_i32_0 = arith.constant 0 : i32
    return %arg0, %arg1, %c0_i32 : i32, i32, i32
  }
}

</mosaic_0001>

<bundles_post_ra>
// kernel: tpu_custom_call.1
= control target key start
LH: loop header
LB: loop body
LE: loop exit
PB: predicated region body
PF: predicated region fallthrough
CT: control target
= control target key end

     0   :  { %s4829_s0 = inlined_call_operand.hbm [shape: f32[2,32,128], index: 0, kind: input, shape index: {}]   ;;  %s4830_s1 = inlined_call_operand.vmem [shape: f32[1,128], index: 1, kind: input, shape index: {}]   ;;  %s4831_s2 = inlined_call_operand.hbm [shape: f32[1,128], index: 2, kind: input, shape index: {}]   ;;  %s4832_s3 = inlined_call_operand.hbm [shape: f32[128,128], index: 3, kind: input, shape index: {}]   ;;  %s4833_s4 = inlined_call_operand.vmem [shape: f32[1,128], index: 4, kind: input, shape index: {}]   ;;  %s4834_s5 = inlined_call_operand.hbm [shape: f32[128,256], index: 5, kind: input, shape index: {}]   ;;  %s4835_s6 = inlined_call_operand.vmem [shape: f32[1,256], index: 6, kind: input, shape index: {}]   ;;  %s4836_s7 = inlined_call_operand.hbm [shape: f32[128,128], index: 7, kind: input, shape index: {}]   ;;  %s4837_s8 = inlined_call_operand.vmem [shape: f32[1,128], index: 8, kind: input, shape index: {}]   ;;  %s4838_s9 = inlined_call_operand.vmem [shape: f32[1,128], index: 9, kind: input, shape index: {}]   ;;  %s4839_s10 = inlined_call_operand.vmem [shape: f32[1,128], index: 10, kind: input, shape index: {}]   ;;  %s4840_s11 = inlined_call_operand.hbm [shape: f32[128,512], index: 11, kind: input, shape index: {}]   ;;  %s4841_s12 = inlined_call_operand.vmem [shape: f32[1,512], index: 12, kind: input, shape index: {}]   ;;  %s4842_s13 = inlined_call_operand.hbm [shape: f32[512,128], index: 13, kind: input, shape index: {}]   ;;  %s4843_s14 = inlined_call_operand.vmem [shape: f32[1,128], index: 14, kind: input, shape index: {}]   ;;  %s4844_s15 = inlined_call_operand.hbm [shape: f32[2,32,128], index: 15, kind: output, shape index: {}]  }
   0x1   :  { %4856 = sst [smem:[#allocation28_spill]] %s4829_s0 }
   0x2   :  { %4857 = sst [smem:[#allocation29_spill]] %s4830_s1 }
   0x3   :  { %4858 = sst [smem:[#allocation30_spill]] %s4831_s2 }
   0x4   :  { %4859 = sst [smem:[#allocation31_spill]] %s4833_s4 }
   0x5   :  { %4860 = sst [smem:[#allocation32_spill]] %s4834_s5 }
   0x6   :  { %4861 = sst [smem:[#allocation33_spill]] %s4835_s6 }
   0x7   :  { %4862 = sst [smem:[#allocation34_spill]] %s4837_s8 }
   0x8   :  { %4863 = sst [smem:[#allocation35_spill]] %s4838_s9 }
   0x9   :  { %4864 = sst [smem:[#allocation36_spill]] %s4839_s10 }
   0xa   :  { %4865 = sst [smem:[#allocation37_spill]] %s4840_s11 }
   0xb   :  { %4866 = sst [smem:[#allocation38_spill]] %s4841_s12 }
   0xc   :  { %4867 = sst [smem:[#allocation39_spill]] %s4843_s14 }
   0xd   :  { %4868 = sst [smem:[#allocation40_spill]] %s4844_s15 }
   0xe   :  { %20 = vsyncpa [#allocation7], 0 }
   0xf   :  { %22 = vsyncpa [#allocation7 + $0x1], 0 }
  0x10   :  { %23 = vsyncpa [#allocation10], 0 }
  0x11   :  { %24 = vsyncpa [#allocation13], 0 }
  0x12   :  { %25 = vsyncpa [#allocation16], 0 }
  0x13   :  { %26 = vsyncpa [#allocation8], 0 }
  0x14   :  { %28 = vsyncpa [#allocation8 + $0x1], 0  ;;  %s4174_s18 = smov 0   ;;  %s4176_s19 = smov 0  }
  0x15   :  { %s4178_s20 = smov 0   ;;  %s4180_s21 = smov 0  }
  0x16   :  { %s4182_s22 = smov 0   ;;  %s4184_s23 = smov 0  }
  0x17   :  { %s4186_s24 = smov 0   ;;  %s4188_s25 = smov 0  }
  0x18   :  { %s4190_s26 = smov 0   ;;  %s4192_s27 = smov 0  }
  0x19   :  { %s4194_s28 = smov 0  }
  0x1a LB: > { %4869 = sst [smem:[#allocation24_spill]] %s4052_s24  ;;  %s2783_s29 = sadd.s32 4294967295, %s4068_s28   ;;  %s4068_s28 = sphi %s4194_s28, %s34_s28   ;;  %s4064_s27 = sphi %s4192_s27, %s4923_s27   ;;  %s4060_s26 = sphi %s4190_s26, %s4922_s26   ;;  %s4056_s25 = sphi %s4188_s25, %s4921_s25   ;;  %s4052_s24 = sphi %s4186_s24, %s4920_s24   ;;  %s4048_s23 = sphi %s4184_s23, %s4919_s23   ;;  %s4044_s22 = sphi %s4182_s22, %s4918_s22   ;;  %s4040_s21 = sphi %s4180_s21, %s4917_s21   ;;  %s4036_s20 = sphi %s4178_s20, %s4916_s20   ;;  %s4032_s19 = sphi %s4176_s19, %s4915_s19   ;;  %s4028_s18 = sphi %s4174_s18, %s4914_s18  }
  0x1b   : > { %4870 = sst [smem:[#allocation25_spill]] %s4056_s25  ;;  %p2785_p0 = scmp.ge.s32.totalorder %s4068_s28, 1 }
  0x1c   : > { %p4231_p1 = scmp.eq.s32.totalorder %s2783_s29, 0  ;;  %p4235_p2 = scmp.eq.s32.totalorder %s2783_s29, 3 }
  0x1d   : > { %p399_p3 = scmp.lt.s32.totalorder %s4068_s28, 5  ;;  %s4070_s15 = smov [#allocation9]  }
  0x1e   : > { %s4871_s30 = scalar_select %p4231_p1, 1, 0 }
  0x1f   : > { %s4872_s16 = scalar_select %p4235_p2, 1, 0 }
  0x20   : > { %p4240_p4 = pnand %p2785_p0, %p399_p3  ;;  %s415_s14 = sshll.u32 %s4070_s15, 4  ;;  %s416_s14 = int_to_ptr.vmem [resolvable:$true] %s415_s14 }
  0x21   : > { %4873 = sst [smem:[#allocation26_spill]] %s4872_s16  ;;  %s4071_s25 = smov [#allocation12]  }
  0x22   : > { %s4874_s17 = scalar_select %p4240_p4, 1, 0 }
  0x23   : > { %p3521_p5 = pneg %p4240_p4  ;;  %s441_s12 = sshll.u32 %s4071_s25, 4  ;;  %s4246_s12 = int_to_ptr.vmem [resolvable:$true] %s441_s12 }
  0x24   : > { %4875 = sst [smem:[#allocation27_spill]] %s4874_s17  ;;  %s4072_s10 = smov [#allocation15]  }
  0x25   : > { %p4250_p6 = pnand %p3521_p5, %p4231_p1  ;;  %s4254_s9 = sshll.u32 %s4072_s10, 4  ;;  %s480_s9 = int_to_ptr.vmem [resolvable:$true] %s4254_s9 }
  0x26   : > { %s4877_s2 = sld [smem:[#allocation30_spill]] }
  0x27   : > { %p4264_p8 = pneg %p4250_p6 }
  0x2c   : > { %s3736_s15 = scalar_lea.hbm %s4877_s2, 16 }
  0x2d   : > { %p3737_p7 = scmp.ne.s32.totalorder %s4877_s2, %s3736_s15  ;;  %p3743_p11 = scmp.lt.u32.totalorder %s3736_s15, %s4877_s2 }
  0x2f   : > { %p3739_p9 = pnand %p4264_p8, %p3737_p7 }
  0x31   : > { %p3740_p10 = pneg %p3739_p9 }
  0x33   : > { %p3745_p12 = pnand %p3743_p11, %p3740_p10 }
  0x35   : > { %3748 = shalt.err (!%p3745_p12)
}
  0x36   : > { %s3749_s4 = scalar_lea.vmem %s416_s14, 16  ;;  %s3756_s1 = scalar_lea.vmem %s416_s14, 32 }
  0x37   : > { %p3750_p13 = scmp.ne.s32.totalorder %s416_s14, %s3749_s4  ;;  %p3757_p5 = scmp.lt.s32.totalorder %s416_s14, %s416_s14 }
  0x38   : > { %p3758_p4 = scmp.lt.s32.totalorder %s3756_s1, %s3749_s4 }
  0x39   : > { %p3752_p0 = pnand %p3750_p13, %p4264_p8 }
  0x3a   : > { %p3759_p2 = por %p3758_p4, %p3757_p5 }
  0x3b   : > { %p3753_p3 = pneg %p3752_p0 }
  0x3d   : > { %p3760_p1 = pnand %p3759_p2, %p3753_p3 }
  0x3f   : > { %3763 = shalt.err (!%p3760_p1)
}
  0x40   : > { %3524 = dma.hbm_to_vmem [thread:$0]  (!%p4250_p6), %s4877_s2, 16, %s416_s14, [#allocation10]  }
  0x41   : > { %s4879_s5 = sld [smem:[#allocation32_spill]] }
  0x47   : > { %s3764_s10 = scalar_lea.hbm %s4879_s5, 4096 }
  0x48   : > { %p3765_p7 = scmp.ne.s32.totalorder %s4879_s5, %s3764_s10  ;;  %p3771_p1 = scmp.lt.u32.totalorder %s3764_s10, %s4879_s5 }
  0x4a   : > { %p3767_p9 = pnand %p3765_p7, %p4264_p8 }
  0x4c   : > { %p3768_p4 = pneg %p3767_p9 }
  0x4e   : > { %p3773_p2 = pnand %p3771_p1, %p3768_p4 }
  0x50   : > { %3776 = shalt.err (!%p3773_p2)
}
  0x51   : > { %s3777_s14 = scalar_lea.vmem %s4246_s12, 4096  ;;  %p3785_p13 = scmp.lt.s32.totalorder %s4246_s12, %s4246_s12 }
  0x52   : > { %p3778_p10 = scmp.ne.s32.totalorder %s4246_s12, %s3777_s14  ;;  %p3786_p0 = scmp.lt.s32.totalorder %s3777_s14, %s3777_s14 }
  0x54   : > { %p3780_p11 = pnand %p3778_p10, %p4264_p8  ;;  %p3787_p3 = por %p3786_p0, %p3785_p13 }
  0x56   : > { %p3781_p12 = pneg %p3780_p11 }
  0x58   : > { %p3788_p5 = pnand %p3787_p3, %p3781_p12 }
  0x5a   : > { %3791 = shalt.err (!%p3788_p5)
}
  0x5b   : > { %s4073_s0 = smov 256   ;;  %s4074_s17 = smov 16  }
  0x5c   : > { %3530 = dma.hbm_to_vmem [thread:$0]  (!%p4250_p6), %s4879_s5, 4096, %s4246_s12, [#allocation13], %s4073_s0, %s4073_s0, %s4074_s17  }
  0x5d   : > { %s4880_s11 = sld [smem:[#allocation37_spill]] }
  0x63   : > { %s3792_s10 = scalar_lea.hbm %s4880_s11, 8192 }
  0x64   : > { %p3793_p7 = scmp.ne.s32.totalorder %s4880_s11, %s3792_s10  ;;  %p3799_p1 = scmp.lt.u32.totalorder %s3792_s10, %s4880_s11 }
  0x66   : > { %p3795_p9 = pnand %p3793_p7, %p4264_p8 }
  0x68   : > { %p3796_p4 = pneg %p3795_p9 }
  0x6a   : > { %p3801_p2 = pnand %p3799_p1, %p3796_p4 }
  0x6c   : > { %3804 = shalt.err (!%p3801_p2)
}
  0x6d   : > { %s3805_s6 = scalar_lea.vmem %s480_s9, 8192  ;;  %p3813_p13 = scmp.lt.s32.totalorder %s480_s9, %s480_s9 }
  0x6e   : > { %p3806_p10 = scmp.ne.s32.totalorder %s480_s9, %s3805_s6  ;;  %p3814_p0 = scmp.lt.s32.totalorder %s3805_s6, %s3805_s6 }
  0x70   : > { %p3808_p11 = pnand %p3806_p10, %p4264_p8  ;;  %p3815_p3 = por %p3814_p0, %p3813_p13 }
  0x72   : > { %p3809_p12 = pneg %p3808_p11 }
  0x74   : > { %p3816_p5 = pnand %p3815_p3, %p3809_p12 }
  0x76   : > { %3819 = shalt.err (!%p3816_p5)
}
  0x77   : > { %s4075_s12 = smov 512   ;;  %s4076_s0 = smov 32  }
  0x78   : > { %3536 = dma.hbm_to_vmem [thread:$0]  (!%p4250_p6), %s4880_s11, 8192, %s480_s9, [#allocation16], %s4075_s12, %s4075_s12, %s4076_s0  }
  0x79   : > { %s4077_s8 = smov [#allocation11]   ;;  %s3820_s4 = scalar_lea.hbm %s4832_s3, 2048 }
  0x7a   : > { %s425_s24 = sshll.u32 %s4077_s8, 4  ;;  %p3821_p7 = scmp.ne.s32.totalorder %s4832_s3, %s3820_s4  ;;  %s426_s24 = int_to_ptr.vmem [resolvable:$true] %s425_s24 }
  0x7b   : > { %p3827_p1 = scmp.lt.u32.totalorder %s3820_s4, %s4832_s3 }
  0x7c   : > { %p3823_p9 = pnand %p3821_p7, %p4264_p8 }
  0x7e   : > { %p3824_p4 = pneg %p3823_p9 }
  0x80   : > { %p3829_p2 = pnand %p3827_p1, %p3824_p4 }
  0x82   : > { %3832 = shalt.err (!%p3829_p2)
}
  0x83   : > { %s3833_s9 = scalar_lea.vmem %s426_s24, 2048  ;;  %p3841_p13 = scmp.lt.s32.totalorder %s426_s24, %s426_s24 }
  0x84   : > { %p3834_p10 = scmp.ne.s32.totalorder %s426_s24, %s3833_s9  ;;  %p3842_p0 = scmp.lt.s32.totalorder %s3833_s9, %s3833_s9 }
  0x86   : > { %p3836_p11 = pnand %p3834_p10, %p4264_p8  ;;  %p3843_p3 = por %p3842_p0, %p3841_p13 }
  0x88   : > { %p3837_p12 = pneg %p3836_p11 }
  0x8a   : > { %p3844_p5 = pnand %p3843_p3, %p3837_p12 }
  0x8c   : > { %3847 = shalt.err (!%p3844_p5)
}
  0x8d   : > { %s4853_s12 = smov 128   ;;  %s4854_s0 = smov 8  }
  0x8e   : > { %3527 = dma.hbm_to_vmem [thread:$0]  (!%p4250_p6), %s4832_s3, 2048, %s426_s24, [#allocation10], %s4853_s12, %s4853_s12, %s4854_s0  }
  0x8f   : > { %s4080_s17 = smov [#allocation14]   ;;  %s4081_s15 = smov [#allocation17]  }
  0x90   : > { %s457_s8 = sshll.u32 %s4080_s17, 4  ;;  %s495_s10 = sshll.u32 %s4081_s15, 4  ;;  %s458_s8 = int_to_ptr.vmem [resolvable:$true] %s457_s8  ;;  %s496_s10 = int_to_ptr.vmem [resolvable:$true] %s495_s10 }
  0x91   : > { %s3848_s14 = scalar_lea.hbm %s4836_s7, 2048 }
  0x92   : > { %p3849_p7 = scmp.ne.s32.totalorder %s4836_s7, %s3848_s14  ;;  %p3855_p1 = scmp.lt.u32.totalorder %s3848_s14, %s4836_s7 }
  0x94   : > { %p3851_p9 = pnand %p3849_p7, %p4264_p8 }
  0x96   : > { %p3852_p4 = pneg %p3851_p9 }
  0x98   : > { %p3857_p2 = pnand %p3855_p1, %p3852_p4 }
  0x9a   : > { %3860 = shalt.err (!%p3857_p2)
}
  0x9b   : > { %s3861_s24 = scalar_lea.vmem %s458_s8, 2048  ;;  %p3869_p13 = scmp.lt.s32.totalorder %s458_s8, %s458_s8 }
  0x9c   : > { %p3862_p10 = scmp.ne.s32.totalorder %s458_s8, %s3861_s24  ;;  %p3870_p0 = scmp.lt.s32.totalorder %s3861_s24, %s3861_s24 }
  0x9e   : > { %p3864_p11 = pnand %p3862_p10, %p4264_p8  ;;  %p3871_p3 = por %p3870_p0, %p3869_p13 }
  0xa0   : > { %p3865_p12 = pneg %p3864_p11 }
  0xa2   : > { %p3872_p5 = pnand %p3871_p3, %p3865_p12 }
  0xa4   : > { %3875 = shalt.err (!%p3872_p5)
}
  0xa5   : > { %3533 = dma.hbm_to_vmem [thread:$0]  (!%p4250_p6), %s4836_s7, 2048, %s458_s8, [#allocation13], %s4853_s12, %s4853_s12, %s4854_s0  }
  0xa6   : > { %s3876_s17 = scalar_lea.hbm %s4842_s13, 8192 }
  0xa7   : > { %p3877_p7 = scmp.ne.s32.totalorder %s4842_s13, %s3876_s17  ;;  %p3883_p1 = scmp.lt.u32.totalorder %s3876_s17, %s4842_s13 }
  0xa9   : > { %p3879_p9 = pnand %p3877_p7, %p4264_p8 }
  0xab   : > { %p3880_p4 = pneg %p3879_p9 }
  0xad   : > { %p3885_p2 = pnand %p3883_p1, %p3880_p4 }
  0xaf   : > { %3888 = shalt.err (!%p3885_p2)
}
  0xb0   : > { %s3889_s6 = scalar_lea.vmem %s496_s10, 8192  ;;  %p3897_p13 = scmp.lt.s32.totalorder %s496_s10, %s496_s10 }
  0xb1   : > { %p3890_p10 = scmp.ne.s32.totalorder %s496_s10, %s3889_s6  ;;  %p3898_p0 = scmp.lt.s32.totalorder %s3889_s6, %s3889_s6 }
  0xb3   : > { %p3892_p11 = pnand %p3890_p10, %p4264_p8  ;;  %p3899_p3 = por %p3898_p0, %p3897_p13 }
  0xb5   : > { %p3893_p12 = pneg %p3892_p11 }
  0xb7   : > { %p3900_p5 = pnand %p3899_p3, %p3893_p12 }
  0xb9   : > { %3903 = shalt.err (!%p3900_p5)
}
  0xba   : > { %3539 = dma.hbm_to_vmem [thread:$0]  (!%p4250_p6), %s4842_s13, 8192, %s496_s10, [#allocation16], %s4853_s12, %s4853_s12, %s4854_s0  }
  0xbb   : > { %s2784_s29 = sadd.s32 4294967294, %s4068_s28   ;;  %s43_s25 = sadd.s32 1, %s4060_s26 }
  0xbc   : > { %s46_s24 = sadd.s32 1, %s4064_s27  ;;  %p44_p8 = scmp.ge.s32.totalorder %s43_s25, 2 }
  0xbd   : > { %s53_s11 = sadd.s32 1, %s4048_s23  ;;  %p60_p7 = scmp.ne.s32.totalorder %s4048_s23, %s4044_s22 }
  0xbe   : > { %p61_p9 = scmp.eq.s32.totalorder %s4068_s28, 0  ;;  %s4925_s25 = smov (%p44_p8, %s43_s25), 0 }
  0xbf   : > { %s4881_s16 = sld [smem:[#allocation26_spill]]  ;;  %s4927_s24 = smov (!%p44_p8, %s46_s24), %s4064_s27 }
  0xc0   : > { %p4395_p4 = por %p61_p9, %p60_p7  ;;  %p66_p6 = scmp.ne.s32.totalorder %s4044_s22, %s4040_s21 }
  0xc1   : > { %p48_p1 = scmp.ge.s32.totalorder %s4927_s24, 2  ;;  %s371_s5 = ssub.s32 %s4060_s26, %s4925_s25 }
  0xc2   : > { %p4883_p2 = scmp.ne.s32.totalorder %s4871_s30, 0  ;;  %s375_s17 = sadd.s32 1, %s4036_s20 }
  0xc3   : > { %s4929_s24 = smov (%p48_p1, %s4927_s24), 0  ;;  %p385_p11 = scmp.ne.s32.totalorder %s4036_s20, %s4032_s19 }
  0xc4   : > { %p4405_p10 = por %p4883_p2, %p66_p6  ;;  %p391_p12 = scmp.ne.s32.totalorder %s4032_s19, %s4028_s18 }
  0xc5   : > { %s50_s15 = ssub.s32 %s4064_s27, %s4929_s24  ;;  %p392_p13 = scmp.eq.s32.totalorder %s2784_s29, 3 }
  0xc6   : > { %p51_p0 = scmp.eq.s32.totalorder %s50_s15, 0  ;;  %s372_s21 = sor.u32 %s371_s5, %s50_s15 }
  0xc7   : > { %p373_p3 = scmp.eq.s32.totalorder %s372_s21, 0  ;;  %p4885_p5 = scmp.ne.s32.totalorder %s4881_s16, 0 }
  0xc8   : > { %s4425_s1 = scalar_select %p51_p0, %s4048_s23, %s53_s11  }
  0xc9   : > { %p4420_p8 = por %p4885_p5, %p385_p11  ;;  %p4430_p7 = por %p392_p13, %p391_p12 }
  0xca   : > { %s4428_s14 = scalar_select %p373_p3, %s4036_s20, %s375_s17  }
  0xcb   : > { %s4886_s4 = scalar_select %p4420_p8, 1, 0 }
  0xcc   : > { %s4887_s6 = scalar_select %p4430_p7, 1, 0 }
  0xcd   : > { %p3554_p9 = scmp.lt.s32.totalorder %s4068_s28, 4  ;;  %s512_s8 = sand.u32 1, %s4048_s23  }
  0xce   : > { %s2854_s9 = sshll.u32 %s4064_s27, 9  ;;  %s2793_s29 = sshll.u32 %s512_s8, 5 }
  0xcf   : > { %s4888_s15 = sld [smem:[#allocation28_spill]]  ;;  %s516_s11 = scalar_lea.vmem [#allocation6], %s2793_s29 }
  0xd0   : > { %s523_s17 = sshll.u32 %s516_s11, 4  ;;  %p4444_p6 = pnand %p3554_p9, %p4395_p4  ;;  %s4448_s17 = int_to_ptr.vmem [resolvable:$true] %s523_s17 }
  0xd1   : > { %s4450_s0 = scalar_lea.sflag [#allocation7], %s512_s8 }
  0xd2   : > { %p3906_p2 = pneg %p4444_p6 }
  0xd5   : > { %s4440_s16 = scalar_lea.hbm %s4888_s15, %s2854_s9  ;;  %s3909_s29 = scalar_lea.hbm %s4888_s15, 1024 }
  0xd6   : > { %s3904_s12 = scalar_lea.hbm %s4440_s16, 512  ;;  %p3910_p4 = scmp.lt.u32.totalorder %s4440_s16, %s4888_s15 }
  0xd7   : > { %p3905_p1 = scmp.ne.s32.totalorder %s4440_s16, %s3904_s12  ;;  %p3911_p13 = scmp.lt.u32.totalorder %s3909_s29, %s3904_s12 }
  0xd8   : > { %p3913_p3 = scmp.lt.u32.totalorder %s3904_s12, %s4440_s16 }
  0xd9   : > { %p3907_p11 = pnand %p3906_p2, %p3905_p1  ;;  %p3912_p0 = por %p3911_p13, %p3910_p4 }
  0xdb   : > { %p3908_p12 = pneg %p3907_p11  ;;  %p3914_p5 = por %p3913_p3, %p3912_p0 }
  0xdd   : > { %p3915_p9 = pnand %p3914_p5, %p3908_p12 }
  0xdf   : > { %3918 = shalt.err (!%p3915_p9)
}
  0xe0   : > { %s3919_s8 = scalar_lea.vmem %s4448_s17, 512  ;;  %s4082_s9 = smov [#allocation6]  }
  0xe1   : > { %p3920_p1 = scmp.ne.s32.totalorder %s4448_s17, %s3919_s8  ;;  %s3924_s10 = sshll.u32 %s4082_s9, 4  ;;  %s3925_s10 = int_to_ptr.vmem [resolvable:$false] %s3924_s10 }
  0xe2   : > { %s3926_s5 = scalar_lea.vmem %s3925_s10, 1024  ;;  %p3927_p8 = scmp.lt.s32.totalorder %s4448_s17, %s3925_s10 }
  0xe3   : > { %p3922_p11 = pnand %p3920_p1, %p3906_p2  ;;  %p3928_p4 = scmp.lt.s32.totalorder %s3926_s5, %s3919_s8 }
  0xe5   : > { %p3923_p7 = pneg %p3922_p11  ;;  %p3929_p13 = por %p3928_p4, %p3927_p8 }
  0xe7   : > { %p3930_p0 = pnand %p3929_p13, %p3923_p7 }
  0xe9   : > { %3933 = shalt.err (!%p3930_p0)
}
  0xea   : > { %s4890_s12 = smov 8   ;;  %s4891_s29 = smov 128  }
  0xeb   : > { %3543 = dma.hbm_to_vmem [thread:$0]  (!%p4444_p6), %s4440_s16, 512, %s4448_s17, %s4450_s0, %s4891_s29, %s4891_s29, %s4890_s12  }
  0xec   : > { %s4892_s11 = sld [smem:[#allocation27_spill]] }
  0xf2   : > { %p4893_p2 = scmp.ne.s32.totalorder %s4892_s11, 0 }
  0xf3   : > { %s537_s9 = sand.u32 (!%p4893_p2), 1, %s4044_s22  }
  0xf4   : > { %535 = sbr.rel (%p4893_p2) target bundleno = 3368 (0xd28), region = 80  ;;  %s2797_s10 = sshll.u32 (!%p4893_p2), %s537_s9, 5 }
  0xf5   : > { %s538_s8 = scalar_lea.sflag (!%p4893_p2), [#allocation7], %s537_s9  ;;  %s4484_s5 = scalar_lea.vmem (!%p4893_p2), [#allocation6], %s2797_s10 }
  0xfb   : > { %4007 = dma.done.wait (%p4405_p10), %s538_s8, 512  }
  0xfc   : > { %4009 = vsyncadd (%p4405_p10), %s538_s8, 4294966784  ;;  %p4894_p8 = scmp.ne.s32.totalorder %s4871_s30, 0 }
  0xfe   : > { %4011 = dma.done.wait (%p4894_p8), [#allocation10], 2064  }
  0xff   : > { %4013 = vsyncadd (%p4894_p8), [#allocation10], 4294965232 }
 0x100   : > { %4015 = dma.done.wait (%p4894_p8), [#allocation13], 6144  }
 0x101   : > { %4017 = vsyncadd (%p4894_p8), [#allocation13], 4294961152 }
 0x102   : > { %4019 = dma.done.wait (%p4894_p8), [#allocation16], 16384  }
 0x103   : > { %4021 = vsyncadd (%p4894_p8), [#allocation16], 4294950912  ;;  %s609_s0 = sand.u32 1, %s4032_s19   ;;  %s4895_s17 = sld [smem:[#allocation24_spill]] }
 0x104   : > { %s2804_s2 = sshll.u32 %s609_s0, 4 }
 0x105   : > { %s4505_s16 = scalar_lea.vmem [#allocation18], %s2804_s2 }
 0x109   : > { %p2805_p10 = scmp.ne.s32.totalorder %s4895_s17, 0 }
 0x10a   : > { %v617_v0 = vld [vmem:[%s4484_s5] sm:$0xff] (!%p2805_p10)  ;;  %v618_v1 = vld [vmem:[%s4484_s5 + $0x8] sm:$0xff] (!%p2805_p10)  ;;  %v619_v2 = vld [vmem:[%s4484_s5 + $0x10] sm:$0xff] (!%p2805_p10)  ;;  %s4896_s12 = sld [smem:[#allocation29_spill]] (!%p2805_p10)  ;;  %s4897_s9 = sld [smem:[#allocation33_spill]] (!%p2805_p10)  ;;  %vm821_vm0 = vcmask (!%p2805_p10), 261120  }
 0x10b   : > { %616 = sbr.rel (%p2805_p10) target bundleno = 960 (0x3c0), region = 112  ;;  %623 = vadd.xlane.f32.xlu0 (!%p2805_p10), %v617_v0  ;;  %625 = vadd.xlane.f32.xlu1 (!%p2805_p10), %v618_v1  ;;  %v620_v3 = vld [vmem:[%s4484_s5 + $0x18] sm:$0xff] (!%p2805_p10)  ;;  %v689_v4 = vld [vmem:[#allocation12 + $0x8] sm:$0xff] (!%p2805_p10)  ;;  %v688_v6 = vld [vmem:[#allocation12] sm:$0xff] (!%p2805_p10)  ;;  %s4084_s10 = smov (!%p2805_p10), 96  }
 0x10c   : > { %v691_v5 = vld [vmem:[#allocation12 + $0x18] sm:$0xff] (!%p2805_p10)  ;;  %v690_v8 = vld [vmem:[#allocation12 + $0x10] sm:$0xff] (!%p2805_p10)  ;;  %v693_v9 = vld [vmem:[#allocation12 + $0x28] sm:$0xff] (!%p2805_p10)  ;;  %s4085_s8 = smov (!%p2805_p10), 64   ;;  %s4086_s2 = smov (!%p2805_p10), 32  }
 0x10d   : > { %v3173_v7 = vpack.c.bf16 (!%p2805_p10), %v691_v5, %v689_v4  ;;  %v695_v10 = vld [vmem:[#allocation12 + $0x38] sm:$0xff] (!%p2805_p10)  ;;  %v3175_v11 = vpack.c.bf16 (!%p2805_p10), %v690_v8, %v688_v6  ;;  %v692_v13 = vld [vmem:[#allocation12 + $0x20] sm:$0xff] (!%p2805_p10)  ;;  %v694_v14 = vld [vmem:[#allocation12 + $0x30] sm:$0xff] (!%p2805_p10) }
 0x10e   : > { %v3177_v12 = vpack.c.bf16 (!%p2805_p10), %v695_v10, %v693_v9  ;;  %v697_v15 = vld [vmem:[#allocation12 + $0x48] sm:$0xff] (!%p2805_p10)  ;;  %v699_v16 = vld [vmem:[#allocation12 + $0x58] sm:$0xff] (!%p2805_p10)  ;;  %v3179_v17 = vpack.c.bf16 (!%p2805_p10), %v694_v14, %v692_v13  ;;  %v696_v19 = vld [vmem:[#allocation12 + $0x40] sm:$0xff] (!%p2805_p10) }
 0x10f   : > { %627 = vadd.xlane.f32.xlu0 (!%p2805_p10), %v619_v2  ;;  %629 = vadd.xlane.f32.xlu1 (!%p2805_p10), %v620_v3  ;;  %v3181_v18 = vpack.c.bf16 (!%p2805_p10), %v699_v16, %v697_v15  ;;  %v698_v20 = vld [vmem:[#allocation12 + $0x50] sm:$0xff] (!%p2805_p10)  ;;  %v701_v38 = vld [vmem:[#allocation12 + $0x68] sm:$0xff] (!%p2805_p10)  ;;  %v703_v39 = vld [vmem:[#allocation12 + $0x78] sm:$0xff] (!%p2805_p10) }
 0x110   : > { %3174 = vmatprep.subr.bf16.mxu0 (!%p2805_p10), %v3173_v7  ;;  %3477 = vmatprep.subr.bf16.mxu1 (!%p2805_p10), %v3173_v7  ;;  %v3183_v21 = vpack.c.bf16 (!%p2805_p10), %v698_v20, %v696_v19  ;;  %v3185_v40 = vpack.c.bf16 (!%p2805_p10), %v703_v39, %v701_v38  ;;  %v700_v41 = vld [vmem:[#allocation12 + $0x60] sm:$0xff] (!%p2805_p10)  ;;  %v702_v42 = vld [vmem:[#allocation12 + $0x70] sm:$0xff] (!%p2805_p10)  ;;  %v705_v44 = vld [vmem:[#allocation12 + $0x88] sm:$0xff] (!%p2805_p10)  ;;  %v722_v38 = vlaneseq (!%p2805_p10) }
 0x111   : > { %3176 = vmatpush1.bf16.msra.mxu0 (!%p2805_p10), %v3175_v11  ;;  %3485 = vmatpush1.bf16.msra.mxu1 (!%p2805_p10), %v3175_v11  ;;  %v3187_v43 = vpack.c.bf16 (!%p2805_p10), %v702_v42, %v700_v41  ;;  %v707_v45 = vld [vmem:[#allocation12 + $0x98] sm:$0xff] (!%p2805_p10)  ;;  %v704_v47 = vld [vmem:[#allocation12 + $0x80] sm:$0xff] (!%p2805_p10)  ;;  %v706_v48 = vld [vmem:[#allocation12 + $0x90] sm:$0xff] (!%p2805_p10) }
 0x112   : > { %3178 = vmatprep.subr.bf16.mxu0 %v3177_v12  ;;  %3478 = vmatprep.subr.bf16.mxu1 %v3177_v12  ;;  %v3189_v46 = vpack.c.bf16 %v707_v45, %v705_v44  ;;  %v3191_v49 = vpack.c.bf16 %v706_v48, %v704_v47  ;;  %v709_v50 = vld [vmem:[#allocation12 + $0xa8] sm:$0xff]  ;;  %v711_v51 = vld [vmem:[#allocation12 + $0xb8] sm:$0xff]  ;;  %v708_v53 = vld [vmem:[#allocation12 + $0xa0] sm:$0xff]  ;;  %v723_v39 = vshrl.u32 %v722_v38, 7 }
 0x113   : > { %v3193_v52 = vpack.c.bf16 %v711_v51, %v709_v50  ;;  %v710_v54 = vld [vmem:[#allocation12 + $0xb0] sm:$0xff]  ;;  %v713_v56 = vld [vmem:[#allocation12 + $0xc8] sm:$0xff]  ;;  %v715_v57 = vld [vmem:[#allocation12 + $0xd8] sm:$0xff] }
 0x114   : > { %v3195_v55 = vpack.c.bf16 %v710_v54, %v708_v53  ;;  %v3197_v58 = vpack.c.bf16 %v715_v57, %v713_v56  ;;  %v712_v59 = vld [vmem:[#allocation12 + $0xc0] sm:$0xff]  ;;  %v714_v60 = vld [vmem:[#allocation12 + $0xd0] sm:$0xff]  ;;  %v717_v61 = vld [vmem:[#allocation12 + $0xe8] sm:$0xff] }
 0x115   : > { %3180 = vmatpush1.bf16.msra.mxu0 %v3179_v17  ;;  %3486 = vmatpush1.bf16.msra.mxu1 %v3179_v17  ;;  %v3199_v62 = vpack.c.bf16 %v714_v60, %v712_v59  ;;  %v719_v63 = vld [vmem:[#allocation12 + $0xf8] sm:$0xff] }
 0x116   : > { %3182 = vmatprep.subr.bf16.mxu0 %v3181_v18  ;;  %3479 = vmatprep.subr.bf16.mxu1 %v3181_v18  ;;  %v2806_v18 = vld [vmem:[%s4896_s12] ss:$0 sm:$0xff]  ;;  %v2807_v20 = vld [vmem:[#allocation9] ss:$0 sm:$0xff] }
 0x119   : > { %3184 = vmatpush1.bf16.msra.mxu0 %v3183_v21  ;;  %3487 = vmatpush1.bf16.msra.mxu1 %v3183_v21 }
 0x11a   : > { %3186 = vmatprep.subr.bf16.mxu0 %v3185_v40  ;;  %3480 = vmatprep.subr.bf16.mxu1 %v3185_v40  ;;  %v728_v40 = vsub.s32 1, %v723_v39 }
 0x11d   : > { %3188 = vmatpush1.bf16.msra.mxu0 %v3187_v43  ;;  %3488 = vmatpush1.bf16.msra.mxu1 %v3187_v43 }
 0x11e   : > { %3190 = vmatprep.subr.bf16.mxu0 %v3189_v46  ;;  %3481 = vmatprep.subr.bf16.mxu1 %v3189_v46 }
 0x121   : > { %3192 = vmatpush1.bf16.msra.mxu0 %v3191_v49  ;;  %3489 = vmatpush1.bf16.msra.mxu1 %v3191_v49 }
 0x122   : > { %3194 = vmatprep.subr.bf16.mxu0 %v3193_v52  ;;  %3482 = vmatprep.subr.bf16.mxu1 %v3193_v52 }
 0x125   : > { %3196 = vmatpush1.bf16.msra.mxu0 %v3195_v55  ;;  %3490 = vmatpush1.bf16.msra.mxu1 %v3195_v55 }
 0x126   : > { %3198 = vmatprep.subr.bf16.mxu0 %v3197_v58  ;;  %3483 = vmatprep.subr.bf16.mxu1 %v3197_v58 }
 0x129   : > { %3200 = vmatpush1.bf16.msra.mxu0 %v3199_v62  ;;  %3491 = vmatpush1.bf16.msra.mxu1 %v3199_v62 }
 0x198   : > { %v624_v22 = vpop.xlane.xlu0 %623  ;;  %v626_v23 = vpop.xlane.xlu1 %625 }
 0x199   : > { %v632_v24 = vmul.f32 0.0078125, %v624_v22  ;;  %v633_v25 = vmul.f32 0.0078125, %v626_v23 }
 0x19b   : > { %v4512_v26 = vsub.f32 %v617_v0, %v632_v24  ;;  %v4514_v27 = vsub.f32 %v618_v1, %v633_v25  ;;  %v716_v0 = vld [vmem:[#allocation12 + $0xe0] sm:$0xff]  ;;  %v718_v1 = vld [vmem:[#allocation12 + $0xf0] sm:$0xff] }
 0x19c   : > { %v628_v28 = vpop.xlane.xlu0 %627  ;;  %v630_v29 = vpop.xlane.xlu1 %629  ;;  %v3203_v4 = vpack.c.bf16 %v718_v1, %v716_v0 }
 0x19d   : > { %v634_v30 = vmul.f32 0.0078125, %v628_v28  ;;  %v640_v31 = vmul.f32 %v4512_v26, %v4512_v26  ;;  %v635_v32 = vmul.f32 0.0078125, %v630_v29  ;;  %v641_v35 = vmul.f32 %v4514_v27, %v4514_v27 }
 0x19f   : > { %v4518_v33 = vsub.f32 %v619_v2, %v634_v30  ;;  %644 = vadd.xlane.f32.xlu0 %v640_v31  ;;  %v4520_v34 = vsub.f32 %v620_v3, %v635_v32  ;;  %v4083_v2 = vmov 0.0   ;;  %v3201_v3 = vpack.c.bf16 %v719_v63, %v717_v61 }
 0x1a0   : > { %796 = vmatprep.mubr.f32.mxu0 %v4083_v2  ;;  %808 = vmatprep.mubr.f32.mxu1 %v4083_v2 }
 0x1a1   : > { %v642_v36 = vmul.f32 %v4518_v33, %v4518_v33  ;;  %v643_v37 = vmul.f32 %v4520_v34, %v4520_v34  ;;  %3202 = vmatprep.subr.bf16.mxu0 %v3201_v3  ;;  %3484 = vmatprep.subr.bf16.mxu1 %v3201_v3 }
 0x1a2   : > { %3204 = vmatpush1.bf16.msra.mxu0 %v3203_v4  ;;  %3492 = vmatpush1.bf16.msra.mxu1 %v3203_v4 }
 0x1a3   : > { %646 = vadd.xlane.f32.xlu0 %v641_v35  ;;  %648 = vadd.xlane.f32.xlu1 %v642_v36 }
 0x1a7   : > { %650 = vadd.xlane.f32.xlu1 %v643_v37 }
 0x22c   : > { %v645_v5 = vpop.xlane.xlu0 %644 }
 0x22d   : > { %v652_v6 = vmul.f32 0.0078125, %v645_v5 }
 0x22f   : > { %v656_v7 = vadd.f32 1e-06, %v652_v6 }
 0x230   : > { %v649_v8 = vpop.xlane.xlu1 %648  ;;  %v647_v9 = vpop.xlane.xlu0 %646 }
 0x231   : > { %3672 = vrsqrt.f32 %v656_v7  ;;  %v654_v10 = vmul.f32 0.0078125, %v649_v8  ;;  %v653_v11 = vmul.f32 0.0078125, %v647_v9 }
 0x233   : > { %v658_v12 = vadd.f32 1e-06, %v654_v10  ;;  %v657_v13 = vadd.f32 1e-06, %v653_v11 }
 0x234   : > { %v651_v14 = vpop.xlane.xlu1 %650 }
 0x235   : > { %3674 = vrsqrt.f32 %v658_v12  ;;  %v655_v15 = vmul.f32 0.0078125, %v651_v14 }
 0x236   : > { %3676 = vrsqrt.f32 %v657_v13 }
 0x237   : > { %v659_v16 = vadd.f32 1e-06, %v655_v15 }
 0x239   : > { %3678 = vrsqrt.f32 %v659_v16 }
 0x23b   : > { %v3673_v17 = vpop.eup %3672 }
 0x23c   : > { %v664_v19 = vmul.f32 %v3673_v17, %v4512_v26 }
 0x23e   : > { %v674_v21 = vmul.f32 %v2806_v18, %v664_v19 }
 0x23f   : > { %v3675_v22 = vpop.eup %3674 }
 0x240   : > { %v3677_v23 = vpop.eup %3676  ;;  %v684_v24 = vadd.f32 %v2807_v20, %v674_v21  ;;  %v666_v25 = vmul.f32 %v3675_v22, %v4518_v33  ;;  %v724_v33 = vsub.s32 0, %v723_v39 }
 0x241   : > { %v665_v28 = vmul.f32 %v3677_v23, %v4514_v27  ;;  %v720_v27 = vld [vmem:[%s4897_s9] sm:$0x3] }
 0x242   : > { %797 = vmatmul.mubr.f32.vlgmr.msra.gmra.mrb[0].mxu0 %v684_v24  ;;  %v676_v29 = vmul.f32 %v2806_v18, %v666_v25  ;;  %v725_v41 = vrot.slane %v720_v27, %v724_v33  ;;  %v729_v42 = vrot.slane %v720_v27, %v728_v40 }
 0x243   : > { %v3679_v30 = vpop.eup %3678  ;;  %802 = vmatprep.mubr.f32.mxu0 %v4083_v2  ;;  %v675_v31 = vmul.f32 %v2806_v18, %v665_v28 }
 0x244   : > { %v686_v32 = vadd.f32 %v2807_v20, %v676_v29  ;;  %v667_v35 = vmul.f32 %v3679_v30, %v4520_v34 }
 0x245   : > { %v685_v36 = vadd.f32 %v2807_v20, %v675_v31 }
 0x246   : > { %809 = vmatmul.mubr.f32.vlgmr.msra.gmra.mrb[0].mxu1 %v686_v32  ;;  %v677_v26 = vmul.f32 %v2806_v18, %v667_v35 }
 0x247   : > { %803 = vmatmul.mubr.f32.gmra.mrb[2].mxu0 %v685_v36  ;;  %814 = vmatprep.mubr.f32.mxu1 %v4083_v2 }
 0x248   : > { %v687_v37 = vadd.f32 %v2807_v20, %v677_v26 }
 0x24a   : > { %815 = vmatmul.mubr.f32.gmra.mrb[2].mxu1 %v687_v37 }
 0x315   : > { %v798_v43 = vpop.f32.mrb[0].mxu0 }
 0x316   : > { %v799_v34 = vadd.f32 %v798_v43, %v725_v41  ;;  %v800_v44 = vpop.f32.mrb[1].mxu0 }
 0x317   : > { %v801_v45 = vadd.f32 %v800_v44, %v729_v42 }
 0x318   : > { %822 = vst.msk [vmem:[#allocation2] sm:$0xff] %vm821_vm0, %v799_v34  ;;  %834 = vrot.lane.b32.xlu0 %v799_v34, %s4084_s10 }
 0x319   : > { %826 = vst.msk [vmem:[#allocation3] sm:$0xff] %vm821_vm0, %v801_v45  ;;  %v810_v46 = vpop.f32.mrb[0].mxu1 }
 0x31a   : > { %v804_v47 = vpop.f32.mrb[2].mxu0  ;;  %v811_v48 = vadd.f32 %v810_v46, %v725_v41  ;;  %v812_v49 = vpop.f32.mrb[1].mxu1 }
 0x31b   : > { %v805_v50 = vadd.f32 %v804_v47, %v725_v41  ;;  %v806_v51 = vpop.f32.mrb[3].mxu0  ;;  %v813_v52 = vadd.f32 %v812_v49, %v729_v42 }
 0x31c   : > { %824 = vst.msk [vmem:[#allocation2 + $0x10] sm:$0xff] %vm821_vm0, %v811_v48  ;;  %v807_v53 = vadd.f32 %v806_v51, %v729_v42  ;;  %838 = vrot.lane.b32.xlu1 %v811_v48, %s4084_s10  ;;  %872 = vrot.lane.b32.xlu0 %v799_v34, %s4085_s8 }
 0x31d   : > { %823 = vst.msk [vmem:[#allocation2 + $0x8] sm:$0xff] %vm821_vm0, %v805_v50  ;;  %828 = vst.msk [vmem:[#allocation3 + $0x10] sm:$0xff] %vm821_vm0, %v813_v52  ;;  %v816_v54 = vpop.f32.mrb[2].mxu1 }
 0x31e   : > { %827 = vst.msk [vmem:[#allocation3 + $0x8] sm:$0xff] %vm821_vm0, %v807_v53  ;;  %v817_v55 = vadd.f32 %v816_v54, %v725_v41  ;;  %v818_v56 = vpop.f32.mrb[3].mxu1 }
 0x31f   : > { %v819_v57 = vadd.f32 %v818_v56, %v729_v42 }
 0x320   : > { %825 = vst.msk [vmem:[#allocation2 + $0x18] sm:$0xff] %vm821_vm0, %v817_v55  ;;  %876 = vrot.lane.b32.xlu0 %v811_v48, %s4085_s8  ;;  %836 = vrot.lane.b32.xlu1 %v805_v50, %s4084_s10 }
 0x321   : > { %829 = vst.msk [vmem:[#allocation3 + $0x18] sm:$0xff] %vm821_vm0, %v819_v57 }
 0x324   : > { %906 = vrot.lane.b32.xlu0 %v799_v34, %s4086_s2  ;;  %840 = vrot.lane.b32.xlu1 %v817_v55, %s4084_s10 }
 0x328   : > { %910 = vrot.lane.b32.xlu0 %v811_v48, %s4086_s2  ;;  %874 = vrot.lane.b32.xlu1 %v805_v50, %s4085_s8 }
 0x32c   : > { %855 = vrot.lane.b32.xlu0 %v801_v45, %s4084_s10  ;;  %878 = vrot.lane.b32.xlu1 %v817_v55, %s4085_s8 }
 0x330   : > { %859 = vrot.lane.b32.xlu0 %v813_v52, %s4084_s10  ;;  %908 = vrot.lane.b32.xlu1 %v805_v50, %s4086_s2 }
 0x334   : > { %889 = vrot.lane.b32.xlu0 %v801_v45, %s4085_s8  ;;  %912 = vrot.lane.b32.xlu1 %v817_v55, %s4086_s2 }
 0x338   : > { %893 = vrot.lane.b32.xlu0 %v813_v52, %s4085_s8  ;;  %857 = vrot.lane.b32.xlu1 %v807_v53, %s4084_s10 }
 0x33c   : > { %923 = vrot.lane.b32.xlu0 %v801_v45, %s4086_s2  ;;  %861 = vrot.lane.b32.xlu1 %v819_v57, %s4084_s10 }
 0x340   : > { %927 = vrot.lane.b32.xlu0 %v813_v52, %s4086_s2  ;;  %891 = vrot.lane.b32.xlu1 %v807_v53, %s4085_s8 }
 0x344   : > { %895 = vrot.lane.b32.xlu1 %v819_v57, %s4085_s8 }
 0x348   : > { %925 = vrot.lane.b32.xlu1 %v807_v53, %s4086_s2 }
 0x34c   : > { %929 = vrot.lane.b32.xlu1 %v819_v57, %s4086_s2 }
 0x38a   : > { %v835_v58 = vpop.permute.xlu0 %834 }
 0x38b   : > { %847 = vst.msk [vmem:[#allocation2 + $0x20] sm:$0xff] %vm821_vm0, %v835_v58 }
 0x38e   : > { %v839_v59 = vpop.permute.xlu1 %838  ;;  %v873_v60 = vpop.permute.xlu0 %872 }
 0x38f   : > { %849 = vst.msk [vmem:[#allocation2 + $0x30] sm:$0xff] %vm821_vm0, %v839_v59  ;;  %885 = vst.msk [vmem:[#allocation2 + $0x40] sm:$0xff] %vm821_vm0, %v873_v60 }
 0x392   : > { %v837_v61 = vpop.permute.xlu1 %836  ;;  %v877_v62 = vpop.permute.xlu0 %876 }
 0x393   : > { %848 = vst.msk [vmem:[#allocation2 + $0x28] sm:$0xff] %vm821_vm0, %v837_v61  ;;  %887 = vst.msk [vmem:[#allocation2 + $0x50] sm:$0xff] %vm821_vm0, %v877_v62 }
 0x396   : > { %v841_v63 = vpop.permute.xlu1 %840  ;;  %v907_v0 = vpop.permute.xlu0 %906 }
 0x397   : > { %850 = vst.msk [vmem:[#allocation2 + $0x38] sm:$0xff] %vm821_vm0, %v841_v63  ;;  %919 = vst.msk [vmem:[#allocation2 + $0x60] sm:$0xff] %vm821_vm0, %v907_v0 }
 0x39a   : > { %v875_v1 = vpop.permute.xlu1 %874  ;;  %v911_v2 = vpop.permute.xlu0 %910 }
 0x39b   : > { %886 = vst.msk [vmem:[#allocation2 + $0x48] sm:$0xff] %vm821_vm0, %v875_v1  ;;  %921 = vst.msk [vmem:[#allocation2 + $0x70] sm:$0xff] %vm821_vm0, %v911_v2 }
 0x39e   : > { %v879_v3 = vpop.permute.xlu1 %878  ;;  %v856_v4 = vpop.permute.xlu0 %855 }
 0x39f   : > { %888 = vst.msk [vmem:[#allocation2 + $0x58] sm:$0xff] %vm821_vm0, %v879_v3  ;;  %868 = vst.msk [vmem:[#allocation3 + $0x20] sm:$0xff] %vm821_vm0, %v856_v4 }
 0x3a2   : > { %v909_v5 = vpop.permute.xlu1 %908  ;;  %v860_v6 = vpop.permute.xlu0 %859 }
 0x3a3   : > { %920 = vst.msk [vmem:[#allocation2 + $0x68] sm:$0xff] %vm821_vm0, %v909_v5  ;;  %870 = vst.msk [vmem:[#allocation3 + $0x30] sm:$0xff] %vm821_vm0, %v860_v6 }
 0x3a6   : > { %v913_v7 = vpop.permute.xlu1 %912  ;;  %v890_v8 = vpop.permute.xlu0 %889 }
 0x3a7   : > { %922 = vst.msk [vmem:[#allocation2 + $0x78] sm:$0xff] %vm821_vm0, %v913_v7  ;;  %902 = vst.msk [vmem:[#allocation3 + $0x40] sm:$0xff] %vm821_vm0, %v890_v8 }
 0x3aa   : > { %v858_v9 = vpop.permute.xlu1 %857  ;;  %v894_v10 = vpop.permute.xlu0 %893 }
 0x3ab   : > { %869 = vst.msk [vmem:[#allocation3 + $0x28] sm:$0xff] %vm821_vm0, %v858_v9  ;;  %904 = vst.msk [vmem:[#allocation3 + $0x50] sm:$0xff] %vm821_vm0, %v894_v10 }
 0x3ae   : > { %v862_v11 = vpop.permute.xlu1 %861  ;;  %v924_v12 = vpop.permute.xlu0 %923 }
 0x3af   : > { %871 = vst.msk [vmem:[#allocation3 + $0x38] sm:$0xff] %vm821_vm0, %v862_v11  ;;  %936 = vst.msk [vmem:[#allocation3 + $0x60] sm:$0xff] %vm821_vm0, %v924_v12 }
 0x3b2   : > { %v892_v13 = vpop.permute.xlu1 %891  ;;  %v928_v14 = vpop.permute.xlu0 %927 }
 0x3b3   : > { %903 = vst.msk [vmem:[#allocation3 + $0x48] sm:$0xff] %vm821_vm0, %v892_v13  ;;  %938 = vst.msk [vmem:[#allocation3 + $0x70] sm:$0xff] %vm821_vm0, %v928_v14 }
 0x3b6   : > { %v896_v15 = vpop.permute.xlu1 %895 }
 0x3b7   : > { %905 = vst.msk [vmem:[#allocation3 + $0x58] sm:$0xff] %vm821_vm0, %v896_v15 }
 0x3ba   : > { %v926_v16 = vpop.permute.xlu1 %925 }
 0x3bb   : > { %937 = vst.msk [vmem:[#allocation3 + $0x68] sm:$0xff] %vm821_vm0, %v926_v16 }
 0x3be   : > { %v930_v17 = vpop.permute.xlu1 %929 }
 0x3bf   : > { %939 = vst.msk [vmem:[#allocation3 + $0x78] sm:$0xff] %vm821_vm0, %v930_v17 }
 0x3c0 PF: > { %s4898_s17 = sld [smem:[#allocation24_spill]]  ;;  %v985_v20 = vld [vmem:[#allocation11] sm:$0xff]  ;;  %v986_v21 = vld [vmem:[#allocation11 + $0x8] sm:$0xff]  ;;  %v987_v22 = vld [vmem:[#allocation11 + $0x10] sm:$0xff]  ;;  %vm1083_vm1 = vcmask 261120   ;;  %s4901_s29 = sld [smem:[#allocation29_spill]] }
 0x3c1   : > { %v3205_v23 = vpack.c.bf16 %v986_v21, %v985_v20  ;;  %v988_v24 = vld [vmem:[#allocation11 + $0x18] sm:$0xff]  ;;  %v989_v37 = vld [vmem:[#allocation11 + $0x20] sm:$0xff]  ;;  %v990_v38 = vld [vmem:[#allocation11 + $0x28] sm:$0xff]  ;;  %s4902_s10 = sld [smem:[#allocation31_spill]]  ;;  %s4087_s8 = smov 96   ;;  %vm1949_vm3 = vcmask 523520  }
 0x3c2   : > { %v3209_v25 = vpack.c.bf16 %v988_v24, %v987_v22  ;;  %v3213_v39 = vpack.c.bf16 %v990_v38, %v989_v37  ;;  %v991_v33 = vld [vmem:[#allocation11 + $0x30] sm:$0xff]  ;;  %v992_v27 = vld [vmem:[#allocation11 + $0x38] sm:$0xff]  ;;  %v993_v41 = vld [vmem:[#allocation11 + $0x40] sm:$0xff]  ;;  %s4088_s2 = smov 64   ;;  %vm1960_vm4 = vcmask 785920   ;;  %vm1971_vm5 = vcmask 1048320  }
 0x3c3   : > { %3206 = vmatprep.subr.bf16.mxu0 %v3205_v23  ;;  %v3217_v40 = vpack.c.bf16 %v992_v27, %v991_v33  ;;  %v994_v42 = vld [vmem:[#allocation11 + $0x48] sm:$0xff]  ;;  %v995_v34 = vld [vmem:[#allocation11 + $0x50] sm:$0xff]  ;;  %v996_v44 = vld [vmem:[#allocation11 + $0x58] sm:$0xff]  ;;  %s4903_s12 = sld [smem:[#allocation34_spill]]  ;;  %s4904_s9 = sld [smem:[#allocation35_spill]] }
 0x3c4   : > { %3208 = vmatpush3.bf16.msra.mxu0 %v3205_v23  ;;  %v3221_v43 = vpack.c.bf16 %v994_v42, %v993_v41  ;;  %v997_v45 = vld [vmem:[#allocation11 + $0x60] sm:$0xff]  ;;  %v3225_v46 = vpack.c.bf16 %v996_v44, %v995_v34  ;;  %v998_v47 = vld [vmem:[#allocation11 + $0x68] sm:$0xff]  ;;  %v999_v49 = vld [vmem:[#allocation11 + $0x70] sm:$0xff]  ;;  %s4768_s11 = scalar_lea.sflag [#allocation8], %s609_s0  ;;  %p4910_p6 = scmp.ne.s32.totalorder %s4886_s4, 0 }
 0x3c5   : > { %3210 = vmatprep.subr.bf16.mxu0 %v3209_v25  ;;  %v3229_v48 = vpack.c.bf16 %v998_v47, %v997_v45  ;;  %v1000_v50 = vld [vmem:[#allocation11 + $0x78] sm:$0xff]  ;;  %v1123_v52 = vld [vmem:[#allocation2] sm:$0xff]  ;;  %vm4590_vm2 = vmpackc.low %vm1083_vm1, %vm1083_vm1 }
 0x3c6   : > { %s2808_s30 = sshll.u32 %s4898_s17, 4  ;;  %v3233_v51 = vpack.c.bf16 %v1000_v50, %v999_v49  ;;  %v1124_v53 = vld [vmem:[#allocation2 + $0x8] sm:$0xff]  ;;  %v2809_v63 = vld [vmem:[%s4901_s29] ss:$0 sm:$0xff]  ;;  %v2810_v1 = vld [vmem:[#allocation9] ss:$0 sm:$0xff] }
 0x3c7   : > { %s941_s21 = scalar_lea.vmem %s4484_s5, %s2808_s30 [#allocation6]  ;;  %v3237_v54 = vpack.c.bf16 %v1124_v53, %v1123_v52  ;;  %v1125_v8 = vld [vmem:[#allocation2 + $0x10] sm:$0xff]  ;;  %v1126_v9 = vld [vmem:[#allocation2 + $0x18] sm:$0xff]  ;;  %v1127_v11 = vld [vmem:[#allocation2 + $0x20] sm:$0xff]  ;;  %s4089_s30 = smov 32  }
 0x3c8   : > { %v4580_v18 = vld [vmem:[%s941_s21] sm:$0xff]  ;;  %v4583_v19 = vld [vmem:[%s941_s21 + $0x8] sm:$0xff]  ;;  %3212 = vmatpush3.bf16.msra.mxu0 %v3209_v25  ;;  %v3243_v10 = vpack.c.bf16 %v1126_v9, %v1125_v8  ;;  %v1129_v21 = vld [vmem:[#allocation2 + $0x30] sm:$0xff]  ;;  %s4906_s5 = sld [smem:[#allocation38_spill]]  ;;  %s2637_s21 = sshll.u32 %s4505_s16, 4  ;;  %s4762_s21 = int_to_ptr.vmem [resolvable:$true] %s2637_s21 }
 0x3c9   : > { %946 = vadd.xlane.f32.xlu0 %v4580_v18  ;;  %3214 = vmatprep.subr.bf16.mxu0 %v3213_v39  ;;  %v1128_v12 = vld [vmem:[#allocation2 + $0x28] sm:$0xff]  ;;  %v2811_v14 = vld [vmem:[%s4902_s10] ss:$0 sm:$0xff]  ;;  %v1130_v22 = vld [vmem:[#allocation2 + $0x38] sm:$0xff]  ;;  %s2849_s10 = sshll.u32 %s4898_s17, 1 }
 0x3ca   : > { %3239 = vmatprep.subr.msk.bf16.mxu1 %vm4590_vm2, %v3237_v54  ;;  %v3249_v13 = vpack.c.bf16 %v1128_v12, %v1127_v11  ;;  %v3255_v24 = vpack.c.bf16 %v1130_v22, %v1129_v21  ;;  %v1134_v37 = vld [vmem:[#allocation2 + $0x58] sm:$0xff]  ;;  %v1135_v42 = vld [vmem:[#allocation2 + $0x60] sm:$0xff]  ;;  %v1137_v44 = vld [vmem:[#allocation2 + $0x70] sm:$0xff] }
 0x3cb   : > { %3242 = vmatpush3.bf16.xpose.msk.msra.mxu1 %vm4590_vm2, %v3237_v54  ;;  %v1138_v45 = vld [vmem:[#allocation2 + $0x78] sm:$0xff]  ;;  %v1139_v54 = vld [vmem:[#allocation3] sm:$0xff]  ;;  %v1145_v11 = vld [vmem:[#allocation3 + $0x30] sm:$0xff] }
 0x3cc   : > { %3216 = vmatpush3.bf16.msra.mxu0 %v3213_v39  ;;  %3245 = vmatprep.subr.msk.bf16.mxu1 %vm4590_vm2, %v3243_v10  ;;  %v1146_v12 = vld [vmem:[#allocation3 + $0x38] sm:$0xff]  ;;  %v1147_v22 = vld [vmem:[#allocation3 + $0x40] sm:$0xff] }
 0x3cd   : > { %948 = vadd.xlane.f32.xlu0 %v4583_v19  ;;  %3218 = vmatprep.subr.bf16.mxu0 %v3217_v40 }
 0x3d0   : > { %3220 = vmatpush3.bf16.msra.mxu0 %v3217_v40 }
 0x3d1   : > { %3222 = vmatprep.subr.bf16.mxu0 %v3221_v43 }
 0x3d3   : > { %3248 = vmatpush3.bf16.xpose.msk.msra.mxu1 %vm4590_vm2, %v3243_v10 }
 0x3d4   : > { %3224 = vmatpush3.bf16.msra.mxu0 %v3221_v43  ;;  %3251 = vmatprep.subr.msk.bf16.mxu1 %vm4590_vm2, %v3249_v13  ;;  %v1136_v43 = vld [vmem:[#allocation2 + $0x68] sm:$0xff] }
 0x3d5   : > { %3226 = vmatprep.subr.bf16.mxu0 %v3225_v46  ;;  %v3273_v34 = vpack.c.bf16 %v1136_v43, %v1135_v42  ;;  %v1153_v43 = vld [vmem:[#allocation3 + $0x70] sm:$0xff] }
 0x3d8   : > { %3228 = vmatpush3.bf16.msra.mxu0 %v3225_v46  ;;  %v3279_v46 = vpack.c.bf16 %v1138_v45, %v1137_v44 }
 0x3d9   : > { %3230 = vmatprep.subr.bf16.mxu0 %v3229_v48 }
 0x3dc   : > { %3232 = vmatpush3.bf16.msra.mxu0 %v3229_v48 }
 0x3dd   : > { %3234 = vmatprep.subr.bf16.mxu0 %v3233_v51 }
 0x3e0   : > { %3236 = vmatpush3.bf16.msra.mxu0 %v3233_v51 }
 0x456   : > { %v947_v28 = vpop.xlane.xlu0 %946 }
 0x457   : > { %v951_v29 = vmul.f32 0.0078125, %v947_v28  ;;  %v1131_v28 = vld [vmem:[#allocation2 + $0x40] sm:$0xff] }
 0x459   : > { %v953_v30 = vsub.f32 %v4580_v18, %v951_v29  ;;  %v1132_v29 = vld [vmem:[#allocation2 + $0x48] sm:$0xff] }
 0x45a   : > { %v949_v31 = vpop.xlane.xlu0 %948 }
 0x45b   : > { %v952_v32 = vmul.f32 0.0078125, %v949_v31  ;;  %v955_v35 = vmul.f32 %v953_v30, %v953_v30 }
 0x45d   : > { %v954_v36 = vsub.f32 %v4583_v19, %v952_v32  ;;  %957 = vadd.xlane.f32.xlu1 %v955_v35 }
 0x45f   : > { %v956_v26 = vmul.f32 %v954_v36, %v954_v36 }
 0x461   : > { %959 = vadd.xlane.f32.xlu1 %v956_v26  ;;  %v1133_v26 = vld [vmem:[#allocation2 + $0x50] sm:$0xff] }
 0x462   : > { %v3267_v33 = vpack.c.bf16 %v1134_v37, %v1133_v26 }
 0x4ea   : > { %v958_v56 = vpop.xlane.xlu1 %957 }
 0x4eb   : > { %v961_v57 = vmul.f32 0.0078125, %v958_v56  ;;  %v1140_v56 = vld [vmem:[#allocation3 + $0x8] sm:$0xff] }
 0x4ed   : > { %v963_v58 = vadd.f32 1e-06, %v961_v57  ;;  %v1141_v57 = vld [vmem:[#allocation3 + $0x10] sm:$0xff] }
 0x4ee   : > { %v960_v59 = vpop.xlane.xlu1 %959 }
 0x4ef   : > { %3680 = vrsqrt.f32 %v963_v58  ;;  %v962_v60 = vmul.f32 0.0078125, %v960_v59  ;;  %v3285_v58 = vpack.c.bf16 %v1140_v56, %v1139_v54  ;;  %v1142_v59 = vld [vmem:[#allocation3 + $0x18] sm:$0xff] }
 0x4f1   : > { %v964_v61 = vadd.f32 1e-06, %v962_v60  ;;  %v3289_v60 = vpack.c.bf16 %v1142_v59, %v1141_v57  ;;  %3286 = vmatprep.subr.bf16.mxu0 %v3285_v58 }
 0x4f3   : > { %3682 = vrsqrt.f32 %v964_v61 }
 0x4f9   : > { %v3681_v62 = vpop.eup %3680 }
 0x4fa   : > { %v967_v0 = vmul.f32 %v3681_v62, %v953_v30  ;;  %v3261_v30 = vpack.c.bf16 %v1132_v29, %v1131_v28  ;;  %v1150_v28 = vld [vmem:[#allocation3 + $0x58] sm:$0xff] }
 0x4fc   : > { %v975_v2 = vmul.f32 %v2809_v63, %v967_v0 }
 0x4fd   : > { %v3683_v3 = vpop.eup %3682 }
 0x4fe   : > { %v968_v4 = vmul.f32 %v3683_v3, %v954_v36  ;;  %v983_v5 = vadd.f32 %v2810_v1, %v975_v2 }
 0x500   : > { %v976_v6 = vmul.f32 %v2809_v63, %v968_v4  ;;  %3047 = vmatprep.mubr.f32.mxu0 %v983_v5  ;;  %v1143_v4 = vld [vmem:[#allocation3 + $0x20] sm:$0xff]  ;;  %v1144_v5 = vld [vmem:[#allocation3 + $0x28] sm:$0xff] }
 0x502   : > { %v984_v7 = vadd.f32 %v2810_v1, %v976_v6  ;;  %v3293_v6 = vpack.c.bf16 %v1144_v5, %v1143_v4 }
 0x504   : > { %3048 = vmatmul.mubr.f32.vlgmr.msra.gmra.mrb[0].mxu0 %v984_v7 }
 0x505   : > { %3288 = vmatpush3.bf16.msra.mxu0 %v3285_v58 }
 0x506   : > { %3290 = vmatprep.subr.bf16.mxu0 %v3289_v60 }
 0x509   : > { %3292 = vmatpush3.bf16.msra.mxu0 %v3289_v60 }
 0x5d7   : > { %v3049_v15 = vpop.f32.mrb[0].mxu0 }
 0x5d8   : > { %v1080_v16 = vadd.f32 %v3049_v15, %v2811_v14  ;;  %v1074_v17 = vpop.f32.mrb[1].mxu0 }
 0x5d9   : > { %v1075_v20 = vadd.f32 %v2811_v14, %v1074_v17  ;;  %v3297_v14 = vpack.c.bf16 %v1146_v12, %v1145_v11 }
 0x5da   : > { %1085 = vst.msk [vmem:[#allocation4 + $0x8] sm:$0xff] %vm1083_vm1, %v1080_v16  ;;  %1090 = vrot.lane.b32.xlu1 %v1080_v16, %s4087_s8 }
 0x5db   : > { %1084 = vst.msk [vmem:[#allocation4] sm:$0xff] %vm1083_vm1, %v1075_v20  ;;  %1088 = vrot.lane.b32.xlu0 %v1075_v20, %s4087_s8 }
 0x5de   : > { %1097 = vrot.lane.b32.xlu1 %v1075_v20, %s4088_s2 }
 0x5df   : > { %1106 = vrot.lane.b32.xlu0 %v1075_v20, %s4089_s30 }
 0x5e1   : > { %v1116_v25 = vld [vmem:[#allocation4 + $0x8] sm:$0xff] }
 0x5e2   : > { %1099 = vrot.lane.b32.xlu1 %v1080_v16, %s4088_s2  ;;  %v1115_v23 = vld [vmem:[#allocation4] sm:$0xff] }
 0x5e3   : > { %3058 = vmatprep.mubr.msk.f32.mxu1 %vm1083_vm1, %v1115_v23  ;;  %v1148_v23 = vld [vmem:[#allocation3 + $0x48] sm:$0xff] }
 0x5e4   : > { %3059 = vmatmul.mubr.msk.f32.vlgmr.msra.gmra.mrb[0].mxu1 %vm1083_vm1, %v1116_v25  ;;  %v1149_v25 = vld [vmem:[#allocation3 + $0x50] sm:$0xff] }
 0x5e5   : > { %3254 = vmatpush3.bf16.xpose.msk.msra.mxu1 %vm4590_vm2, %v3249_v13 }
 0x5e6   : > { %1108 = vrot.lane.b32.xlu1 %v1080_v16, %s4089_s30  ;;  %3257 = vmatprep.subr.msk.bf16.mxu1 %vm4590_vm2, %v3255_v24 }
 0x5ed   : > { %3260 = vmatpush3.bf16.xpose.msk.msra.mxu1 %vm4590_vm2, %v3255_v24  ;;  %v3301_v24 = vpack.c.bf16 %v1148_v23, %v1147_v22  ;;  %v1978_v22 = vld [vmem:[#allocation14 + $0x10] sm:$0xff] }
 0x5ee   : > { %3263 = vmatprep.subr.msk.bf16.mxu1 %vm4590_vm2, %v3261_v30 }
 0x5ef   : > { %3302 = vmatprep.subr.bf16.mxu0 %v3301_v24 }
 0x64c   : > { %v1091_v31 = vpop.permute.xlu1 %1090 }
 0x64d   : > { %1096 = vst.msk [vmem:[#allocation4 + $0x18] sm:$0xff] %vm1083_vm1, %v1091_v31  ;;  %v1089_v32 = vpop.permute.xlu0 %1088 }
 0x64e   : > { %1095 = vst.msk [vmem:[#allocation4 + $0x10] sm:$0xff] %vm1083_vm1, %v1089_v32  ;;  %v1151_v32 = vld [vmem:[#allocation3 + $0x60] sm:$0xff] }
 0x650   : > { %v1098_v35 = vpop.permute.xlu1 %1097 }
 0x651   : > { %1104 = vst.msk [vmem:[#allocation4 + $0x20] sm:$0xff] %vm1083_vm1, %v1098_v35  ;;  %v1107_v36 = vpop.permute.xlu0 %1106  ;;  %v1152_v35 = vld [vmem:[#allocation3 + $0x68] sm:$0xff] }
 0x652   : > { %1113 = vst.msk [vmem:[#allocation4 + $0x30] sm:$0xff] %vm1083_vm1, %v1107_v36  ;;  %v3309_v36 = vpack.c.bf16 %v1152_v35, %v1151_v32 }
 0x654   : > { %v1100_v38 = vpop.permute.xlu1 %1099  ;;  %v1118_v27 = vld [vmem:[#allocation4 + $0x18] sm:$0xff] }
 0x655   : > { %1105 = vst.msk [vmem:[#allocation4 + $0x28] sm:$0xff] %vm1083_vm1, %v1100_v38  ;;  %v1117_v39 = vld [vmem:[#allocation4 + $0x10] sm:$0xff] }
 0x656   : > { %3069 = vmatprep.mubr.msk.f32.mxu1 %vm1083_vm1, %v1117_v39 }
 0x657   : > { %3070 = vmatmul.mubr.msk.f32.vlgmr.msra.gmra.mrb[2].mxu1 %vm1083_vm1, %v1118_v27 }
 0x658   : > { %3266 = vmatpush3.bf16.xpose.msk.msra.mxu1 %vm4590_vm2, %v3261_v30  ;;  %v1109_v40 = vpop.permute.xlu1 %1108  ;;  %v1119_v41 = vld [vmem:[#allocation4 + $0x20] sm:$0xff]  ;;  %v3305_v30 = vpack.c.bf16 %v1150_v28, %v1149_v25 }
 0x659   : > { %1114 = vst.msk [vmem:[#allocation4 + $0x38] sm:$0xff] %vm1083_vm1, %v1109_v40  ;;  %3080 = vmatprep.mubr.msk.f32.mxu1 %vm1083_vm1, %v1119_v41  ;;  %3269 = vmatprep.subr.msk.bf16.mxu1 %vm4590_vm2, %v3267_v33  ;;  %v1121_v48 = vld [vmem:[#allocation4 + $0x30] sm:$0xff] }
 0x65c   : > { %v1120_v47 = vld [vmem:[#allocation4 + $0x28] sm:$0xff] }
 0x660   : > { %3272 = vmatpush3.bf16.xpose.msk.msra.mxu1 %vm4590_vm2, %v3267_v33  ;;  %v1122_v49 = vld [vmem:[#allocation4 + $0x38] sm:$0xff] }
 0x661   : > { %3275 = vmatprep.subr.msk.bf16.mxu1 %vm4590_vm2, %v3273_v34 }
 0x667   : > { %3081 = vmatmul.mubr.msk.f32.vlgmr.msra.gmra.mrb[4].mxu1 %vm1083_vm1, %v1120_v47 }
 0x668   : > { %3278 = vmatpush3.bf16.xpose.msk.msra.mxu1 %vm4590_vm2, %v3273_v34  ;;  %3091 = vmatprep.mubr.msk.f32.mxu1 %vm1083_vm1, %v1121_v48  ;;  %v1154_v34 = vld [vmem:[#allocation3 + $0x78] sm:$0xff] }
 0x669   : > { %3281 = vmatprep.subr.msk.bf16.mxu1 %vm4590_vm2, %v3279_v46 }
 0x670   : > { %3284 = vmatpush3.bf16.xpose.msk.msra.mxu1 %vm4590_vm2, %v3279_v46 }
 0x671   : > { %3294 = vmatprep.subr.bf16.mxu1 %v3293_v6 }
 0x677   : > { %3092 = vmatmul.mubr.msk.f32.vlgmr.msra.gmra.mrb[6].mxu1 %vm1083_vm1, %v1122_v49  ;;  %v3313_v49 = vpack.c.bf16 %v1154_v34, %v1153_v43  ;;  %v1987_v43 = vld [vmem:[#allocation14 + $0x58] sm:$0xff] }
 0x678   : > { %3296 = vmatpush3.bf16.msra.mxu1 %v3293_v6 }
 0x679   : > { %3298 = vmatprep.subr.bf16.mxu1 %v3297_v14 }
 0x67c   : > { %3300 = vmatpush3.bf16.msra.mxu1 %v3297_v14 }
 0x67d   : > { %3310 = vmatprep.subr.bf16.mxu1 %v3309_v36 }
 0x6b7   : > { %v3060_v50 = vpop.f32.mrb[0].mxu1 }
 0x6b8   : > { %v1239_v51 = vpop.f32.mrb[1].mxu1  ;;  %v1530_v52 = vsel %vm1083_vm1, %v3060_v50, -inf }
 0x6b9   : > { %1531 = vmax.xlane.f32.xlu1 %v1530_v52  ;;  %v1527_v53 = vsel %vm1083_vm1, %v1239_v51, -inf }
 0x6ba   : > { %1528 = vmax.xlane.f32.xlu0 %v1527_v53 }
 0x72a   : > { %v3071_v55 = vpop.f32.mrb[2].mxu1 }
 0x72b   : > { %v1332_v61 = vpop.f32.mrb[3].mxu1  ;;  %v1536_v62 = vsel %vm1083_vm1, %v3071_v55, -inf }
 0x72c   : > { %1537 = vmax.xlane.f32.xlu0 %v1536_v62  ;;  %v1533_v63 = vsel %vm1083_vm1, %v1332_v61, -inf }
 0x730   : > { %1534 = vmax.xlane.f32.xlu0 %v1533_v63 }
 0x73a   : > { %v4658_v0 = vpop.f32.mrb[4].mxu1 }
 0x73b   : > { %v4660_v1 = vpop.f32.mrb[5].mxu1  ;;  %v1542_v2 = vsel %vm1083_vm1, %v4658_v0, -inf }
 0x73c   : > { %1543 = vmax.xlane.f32.xlu1 %v1542_v2  ;;  %v1539_v3 = vsel %vm1083_vm1, %v4660_v1, -inf }
 0x73d   : > { %1540 = vmax.xlane.f32.xlu0 %v1539_v3 }
 0x746   : > { %v1532_v7 = vpop.xlane.xlu1 %1531 }
 0x747   : > { %v1552_v8 = vsub.f32 %v3060_v50, %v1532_v7  ;;  %v1529_v9 = vpop.xlane.xlu0 %1528 }
 0x748   : > { %v1551_v10 = vsub.f32 %v1239_v51, %v1529_v9 }
 0x749   : > { %v1561_v13 = vmul.f32 1.442695, %v1552_v8 }
 0x74a   : > { %v1559_v15 = vmul.f32 1.442695, %v1551_v10  ;;  %v4666_v16 = vpop.f32.mrb[6].mxu1 }
 0x74b   : > { %v4668_v17 = vpop.f32.mrb[7].mxu1  ;;  %v1548_v20 = vsel %vm1083_vm1, %v4666_v16, -inf }
 0x74c   : > { %3684 = vpow2.f32 %v1559_v15  ;;  %1549 = vmax.xlane.f32.xlu1 %v1548_v20  ;;  %v1545_v21 = vsel %vm1083_vm1, %v4668_v17, -inf  ;;  %v1976_v20 = vld [vmem:[#allocation14] sm:$0xff] }
 0x74d   : > { %3686 = vpow2.f32 %v1561_v13  ;;  %1546 = vmax.xlane.f32.xlu0 %v1545_v21  ;;  %v1977_v21 = vld [vmem:[#allocation14 + $0x8] sm:$0xff] }
 0x74e   : > { %v3317_v23 = vpack.c.bf16 %v1977_v21, %v1976_v20  ;;  %v2116_v20 = vld [vmem:[#allocation15] sm:$0xff] }
 0x74f   : > { %v2120_v21 = vld [vmem:[#allocation15 + $0x20] sm:$0xff] }
 0x756   : > { %v4674_v29 = vpop.eup %3684 }
 0x757   : > { %v4676_v31 = vpop.eup %3686  ;;  %3102 = vmatprep.mubr.msk.f32.mxu0 %vm1083_vm1, %v4674_v29  ;;  %v1575_v3 = vsel %vm1083_vm1, %v4674_v29, 0.0 }
 0x758   : > { %3103 = vmatmul.mubr.msk.f32.vlgmr.msra.gmra.mrb[2].mxu0 %vm1083_vm1, %v4676_v31  ;;  %v1578_v2 = vsel %vm1083_vm1, %v4676_v31, 0.0 }
 0x759   : > { %3304 = vmatpush3.bf16.msra.mxu0 %v3301_v24  ;;  %v1979_v24 = vld [vmem:[#allocation14 + $0x18] sm:$0xff] }
 0x75a   : > { %3306 = vmatprep.subr.bf16.mxu0 %v3305_v30  ;;  %v3321_v25 = vpack.c.bf16 %v1979_v24, %v1978_v22  ;;  %v2118_v24 = vld [vmem:[#allocation15 + $0x10] sm:$0xff] }
 0x75d   : > { %3308 = vmatpush3.bf16.msra.mxu0 %v3305_v30 }
 0x75e   : > { %3318 = vmatprep.subr.bf16.mxu0 %v3317_v23 }
 0x7b9   : > { %v1538_v26 = vpop.xlane.xlu0 %1537 }
 0x7ba   : > { %v1554_v37 = vsub.f32 %v3071_v55, %v1538_v26  ;;  %v1981_v26 = vld [vmem:[#allocation14 + $0x28] sm:$0xff] }
 0x7bc   : > { %v1565_v38 = vmul.f32 1.442695, %v1554_v37 }
 0x7bd   : > { %v1535_v39 = vpop.xlane.xlu0 %1534 }
 0x7be   : > { %3688 = vpow2.f32 %v1565_v38  ;;  %v1553_v33 = vsub.f32 %v1332_v61, %v1535_v39  ;;  %v1982_v38 = vld [vmem:[#allocation14 + $0x30] sm:$0xff]  ;;  %v1983_v39 = vld [vmem:[#allocation14 + $0x38] sm:$0xff] }
 0x7c0   : > { %v1563_v27 = vmul.f32 1.442695, %v1553_v33  ;;  %v3329_v33 = vpack.c.bf16 %v1983_v39, %v1982_v38  ;;  %v2130_v38 = vld [vmem:[#allocation15 + $0x70] sm:$0xff]  ;;  %v2133_v39 = vld [vmem:[#allocation15 + $0x88] sm:$0xff] }
 0x7c2   : > { %3690 = vpow2.f32 %v1563_v27  ;;  %v1984_v27 = vld [vmem:[#allocation14 + $0x40] sm:$0xff] }
 0x7c8   : > { %v3689_v40 = vpop.eup %3688 }
 0x7c9   : > { %v1544_v41 = vpop.xlane.xlu1 %1543  ;;  %v1584_v42 = vsel %vm1083_vm1, %v3689_v40, 0.0 }
 0x7ca   : > { %v1556_v44 = vsub.f32 %v4658_v0, %v1544_v41  ;;  %v1541_v45 = vpop.xlane.xlu0 %1540  ;;  %1585 = vadd.xlane.f32.xlu1 %v1584_v42  ;;  %v1986_v42 = vld [vmem:[#allocation14 + $0x50] sm:$0xff] }
 0x7cb   : > { %v1555_v46 = vsub.f32 %v4660_v1, %v1541_v45  ;;  %v3337_v34 = vpack.c.bf16 %v1987_v43, %v1986_v42  ;;  %v2139_v42 = vld [vmem:[#allocation15 + $0xb8] sm:$0xff]  ;;  %v2132_v43 = vld [vmem:[#allocation15 + $0x80] sm:$0xff] }
 0x7cc   : > { %v3691_v47 = vpop.eup %3690  ;;  %v1569_v48 = vmul.f32 1.442695, %v1556_v44 }
 0x7cd   : > { %v1567_v50 = vmul.f32 1.442695, %v1555_v46  ;;  %3113 = vmatprep.mubr.msk.f32.mxu1 %vm1083_vm1, %v3691_v47  ;;  %v1581_v51 = vsel %vm1083_vm1, %v3691_v47, 0.0 }
 0x7ce   : > { %3692 = vpow2.f32 %v1569_v48  ;;  %3114 = vmatmul.mubr.msk.f32.vlgmr.msra.gmra.mrb[8].mxu1 %vm1083_vm1, %v3689_v40  ;;  %1582 = vadd.xlane.f32.xlu0 %v1581_v51  ;;  %v1985_v40 = vld [vmem:[#allocation14 + $0x48] sm:$0xff] }
 0x7cf   : > { %3694 = vpow2.f32 %v1567_v50  ;;  %3312 = vmatpush3.bf16.msra.mxu1 %v3309_v36  ;;  %v1980_v36 = vld [vmem:[#allocation14 + $0x20] sm:$0xff]  ;;  %v3333_v41 = vpack.c.bf16 %v1985_v40, %v1984_v27  ;;  %v1989_v51 = vld [vmem:[#allocation14 + $0x68] sm:$0xff] }
 0x7d0   : > { %3314 = vmatprep.subr.bf16.mxu1 %v3313_v49  ;;  %v3325_v37 = vpack.c.bf16 %v1981_v26, %v1980_v36  ;;  %v1988_v50 = vld [vmem:[#allocation14 + $0x60] sm:$0xff]  ;;  %v2126_v26 = vld [vmem:[#allocation15 + $0x50] sm:$0xff] }
 0x7d1   : > { %v2128_v36 = vld [vmem:[#allocation15 + $0x60] sm:$0xff]  ;;  %v3387_v27 = vpack.c.bf16 %v2130_v38, %v2126_v26  ;;  %v2167_v26 = vld [vmem:[#allocation15 + $0x198] sm:$0xff]  ;;  %v4090_v38 = vmov 0.0  }
 0x7d3   : > { %3316 = vmatpush3.bf16.msra.mxu1 %v3313_v49 }
 0x7d8   : > { %v3693_v52 = vpop.eup %3692 }
 0x7d9   : > { %v3695_v53 = vpop.eup %3694  ;;  %v1550_v54 = vpop.xlane.xlu1 %1549  ;;  %v1590_v56 = vsel %vm1083_vm1, %v3693_v52, 0.0 }
 0x7da   : > { %v1558_v57 = vsub.f32 %v4666_v16, %v1550_v54  ;;  %3124 = vmatprep.mubr.msk.f32.mxu0 %vm1083_vm1, %v3695_v53  ;;  %1591 = vadd.xlane.f32.xlu1 %v1590_v56  ;;  %v1547_v58 = vpop.xlane.xlu0 %1546  ;;  %v1587_v59 = vsel %vm1083_vm1, %v3695_v53, 0.0  ;;  %v1990_v53 = vld [vmem:[#allocation14 + $0x70] sm:$0xff]  ;;  %v1991_v54 = vld [vmem:[#allocation14 + $0x78] sm:$0xff] }
 0x7db   : > { %v1557_v60 = vsub.f32 %v4668_v17, %v1547_v58  ;;  %3125 = vmatmul.mubr.msk.f32.vlgmr.msra.gmra.mrb[4].mxu0 %vm1083_vm1, %v3693_v52  ;;  %1588 = vadd.xlane.f32.xlu0 %v1587_v59  ;;  %v3341_v52 = vpack.c.bf16 %v1989_v51, %v1988_v50  ;;  %v3345_v56 = vpack.c.bf16 %v1991_v54, %v1990_v53 }
 0x7dc   : > { %v1573_v55 = vmul.f32 1.442695, %v1558_v57  ;;  %3320 = vmatpush3.bf16.msra.mxu0 %v3317_v23  ;;  %v3351_v23 = vpack.c.bf16 %v2120_v21, %v2116_v20  ;;  %v2157_v21 = vld [vmem:[#allocation15 + $0x148] sm:$0xff] }
 0x7dd   : > { %v1571_v61 = vmul.f32 1.442695, %v1557_v60  ;;  %3322 = vmatprep.subr.bf16.mxu0 %v3321_v25 }
 0x7de   : > { %3696 = vpow2.f32 %v1573_v55 }
 0x7df   : > { %3698 = vpow2.f32 %v1571_v61 }
 0x7e0   : > { %3324 = vmatpush3.bf16.msra.mxu0 %v3321_v25  ;;  %v2122_v25 = vld [vmem:[#allocation15 + $0x30] sm:$0xff] }
 0x7e1   : > { %3326 = vmatprep.subr.bf16.mxu0 %v3325_v37 }
 0x7e4   : > { %3328 = vmatpush3.bf16.msra.mxu0 %v3325_v37 }
 0x7e5   : > { %3330 = vmatprep.subr.bf16.mxu0 %v3329_v33 }
 0x7e8   : > { %v3697_v62 = vpop.eup %3696  ;;  %3332 = vmatpush3.bf16.msra.mxu0 %v3329_v33  ;;  %v2137_v33 = vld [vmem:[#allocation15 + $0xa8] sm:$0xff] }
 0x7e9   : > { %v3699_v63 = vpop.eup %3698  ;;  %v1596_v0 = vsel %vm1083_vm1, %v3697_v62, 0.0  ;;  %3334 = vmatprep.subr.bf16.mxu0 %v3333_v41  ;;  %v3357_v40 = vpack.c.bf16 %v2137_v33, %v2133_v39 }
 0x7ea   : > { %1597 = vadd.xlane.f32.xlu1 %v1596_v0  ;;  %3135 = vmatprep.mubr.msk.f32.mxu1 %vm1083_vm1, %v3699_v63  ;;  %v1593_v1 = vsel %vm1083_vm1, %v3699_v63, 0.0 }
 0x7eb   : > { %3136 = vmatmul.mubr.msk.f32.vlgmr.msra.gmra.mrb[10].mxu1 %vm1083_vm1, %v3697_v62  ;;  %1594 = vadd.xlane.f32.xlu0 %v1593_v1 }
 0x7ec   : > { %3336 = vmatpush3.bf16.msra.mxu0 %v3333_v41  ;;  %v2135_v41 = vld [vmem:[#allocation15 + $0x98] sm:$0xff]  ;;  %2266 = vmatprep.mubr.f32.mxu1 %v4090_v38 }
 0x7ed   : > { %3338 = vmatprep.subr.bf16.mxu0 %v3337_v34 }
 0x7ee   : > { %1579 = vadd.xlane.f32.xlu1 %v1578_v2 }
 0x7ef   : > { %1576 = vadd.xlane.f32.xlu0 %v1575_v3 }
 0x7f0   : > { %3340 = vmatpush3.bf16.msra.mxu0 %v3337_v34  ;;  %v3389_v34 = vpack.c.bf16 %v2139_v42, %v2135_v41  ;;  %v2166_v41 = vld [vmem:[#allocation15 + $0x190] sm:$0xff] }
 0x7f1   : > { %3342 = vmatprep.subr.bf16.mxu0 %v3341_v52 }
 0x7f4   : > { %3344 = vmatpush3.bf16.msra.mxu0 %v3341_v52 }
 0x7f5   : > { %3346 = vmatprep.subr.bf16.mxu0 %v3345_v56 }
 0x7f8   : > { %3348 = vmatpush3.bf16.msra.mxu0 %v3345_v56 }
 0x82b   : > { %v3104_v4 = vpop.f32.mrb[2].mxu0 }
 0x82c   : > { %v1671_v5 = vpop.f32.mrb[3].mxu0 }
 0x857   : > { %v1586_v6 = vpop.xlane.xlu1 %1585 }
 0x85b   : > { %v1583_v7 = vpop.xlane.xlu0 %1582 }
 0x867   : > { %v1592_v8 = vpop.xlane.xlu1 %1591 }
 0x868   : > { %v1589_v9 = vpop.xlane.xlu0 %1588 }
 0x877   : > { %v1598_v10 = vpop.xlane.xlu1 %1597 }
 0x878   : > { %v4702_v11 = vpop.xlane.xlu0 %1594 }
 0x87b   : > { %v1580_v12 = vpop.xlane.xlu1 %1579 }
 0x87c   : > { %3700 = vrcp.f32 %v1580_v12  ;;  %v1577_v13 = vpop.xlane.xlu0 %1576 }
 0x87d   : > { %3702 = vrcp.f32 %v1577_v13  ;;  %v2117_v13 = vld [vmem:[#allocation15 + $0x8] sm:$0xff] }
 0x87e   : > { %3704 = vrcp.f32 %v1586_v6  ;;  %v2844_v6 = vld [vmem:[%s4903_s12] ss:$0 sm:$0xff]  ;;  %s4907_s12 = sld [smem:[#allocation25_spill]] }
 0x87f   : > { %3706 = vrcp.f32 %v1583_v7 }
 0x880   : > { %3708 = vrcp.f32 %v1592_v8 }
 0x881   : > { %3710 = vrcp.f32 %v1589_v9 }
 0x882   : > { %3712 = vrcp.f32 %v1598_v10 }
 0x883   : > { %3714 = vrcp.f32 %v4702_v11 }
 0x886   : > { %v3701_v14 = vpop.eup %3700 }
 0x887   : > { %v3703_v15 = vpop.eup %3702  ;;  %v1932_v16 = vmul.f32 %v3701_v14, %v3104_v4  ;;  %v2121_v14 = vld [vmem:[#allocation15 + $0x28] sm:$0xff] }
 0x888   : > { %v1931_v17 = vmul.f32 %v3703_v15, %v1671_v5  ;;  %v3705_v28 = vpop.eup %3704  ;;  %v2119_v15 = vld [vmem:[#allocation15 + $0x18] sm:$0xff] }
 0x889   : > { %1940 = vst.msk [vmem:[#allocation5 + $0x8] sm:$0xff] %vm1083_vm1, %v1932_v16  ;;  %v3707_v30 = vpop.eup %3706  ;;  %v3349_v16 = vpack.c.bf16 %v2121_v14, %v2117_v13  ;;  %v2152_v13 = vld [vmem:[#allocation15 + $0x120] sm:$0xff] }
 0x88a   : > { %1939 = vst.msk [vmem:[#allocation5] sm:$0xff] %vm1083_vm1, %v1931_v17  ;;  %v3709_v44 = vpop.eup %3708  ;;  %v2123_v17 = vld [vmem:[#allocation15 + $0x38] sm:$0xff] }
 0x88b   : > { %v3711_v48 = vpop.eup %3710  ;;  %v3381_v22 = vpack.c.bf16 %v2123_v17, %v2119_v15  ;;  %3350 = vmatprep.subr.bf16.mxu1 %v3349_v16  ;;  %v2150_v16 = vld [vmem:[#allocation15 + $0x110] sm:$0xff] }
 0x88c   : > { %v3713_v57 = vpop.eup %3712  ;;  %3352 = vmatpush1.bf16.msra.mxu1 %v3351_v23  ;;  %v2154_v17 = vld [vmem:[#allocation15 + $0x130] sm:$0xff]  ;;  %v2159_v23 = vld [vmem:[#allocation15 + $0x158] sm:$0xff] }
 0x88d   : > { %v3715_v59 = vpop.eup %3714  ;;  %3382 = vmatprep.subr.bf16.mxu0 %v3381_v22  ;;  %v3399_v20 = vpack.c.bf16 %v2154_v17, %v2150_v16  ;;  %v2161_v22 = vld [vmem:[#allocation15 + $0x168] sm:$0xff]  ;;  %v2414_v16 = vld [vmem:[#allocation17 + $0x90] sm:$0xff] }
 0x8a1   : > { %v3115_v29 = vpop.f32.mrb[8].mxu1 }
 0x8a2   : > { %v1934_v31 = vmul.f32 %v3705_v28, %v3115_v29  ;;  %v1752_v32 = vpop.f32.mrb[9].mxu1  ;;  %v3383_v28 = vpack.c.bf16 %v2122_v25, %v2118_v24  ;;  %v2127_v29 = vld [vmem:[#allocation15 + $0x58] sm:$0xff]  ;;  %v3369_v24 = vpack.c.bf16 %v2161_v22, %v2157_v21  ;;  %v2446_v21 = vld [vmem:[#allocation17 + $0x190] sm:$0xff] }
 0x8a3   : > { %v1933_v35 = vmul.f32 %v3707_v30, %v1752_v32  ;;  %v2131_v30 = vld [vmem:[#allocation15 + $0x78] sm:$0xff] }
 0x8a4   : > { %1945 = vrot.lane.b32.xlu1 %v1934_v31, %s4089_s30  ;;  %v3385_v32 = vpack.c.bf16 %v2131_v30, %v2127_v29  ;;  %v2163_v25 = vld [vmem:[#allocation15 + $0x178] sm:$0xff]  ;;  %v2158_v30 = vld [vmem:[#allocation15 + $0x150] sm:$0xff] }
 0x8a5   : > { %1943 = vrot.lane.b32.xlu0 %v1933_v35, %s4089_s30  ;;  %v2124_v35 = vld [vmem:[#allocation15 + $0x40] sm:$0xff]  ;;  %v2447_v22 = vld [vmem:[#allocation17 + $0x198] sm:$0xff] }
 0x8a6   : > { %v3355_v37 = vpack.c.bf16 %v2128_v36, %v2124_v35  ;;  %v2169_v36 = vld [vmem:[#allocation15 + $0x1a8] sm:$0xff] }
 0x8ae   : > { %v3126_v45 = vpop.f32.mrb[4].mxu0 }
 0x8af   : > { %v1936_v46 = vmul.f32 %v3709_v44, %v3126_v45  ;;  %v1833_v47 = vpop.f32.mrb[5].mxu0  ;;  %v2136_v44 = vld [vmem:[#allocation15 + $0xa0] sm:$0xff]  ;;  %v2134_v45 = vld [vmem:[#allocation15 + $0x90] sm:$0xff] }
 0x8b0   : > { %v1935_v49 = vmul.f32 %v3711_v48, %v1833_v47  ;;  %v3359_v47 = vpack.c.bf16 %v2136_v44, %v2132_v43  ;;  %v2170_v43 = vld [vmem:[#allocation15 + $0x1b0] sm:$0xff]  ;;  %v2177_v44 = vld [vmem:[#allocation15 + $0x1e8] sm:$0xff] }
 0x8b1   : > { %1956 = vrot.lane.b32.xlu1 %v1936_v46, %s4088_s2  ;;  %v2138_v46 = vld [vmem:[#allocation15 + $0xb0] sm:$0xff] }
 0x8b2   : > { %v3391_v48 = vpack.c.bf16 %v2138_v46, %v2134_v45  ;;  %v3407_v45 = vpack.c.bf16 %v2170_v43, %v2166_v41  ;;  %v2401_v43 = vld [vmem:[#allocation17 + $0x28] sm:$0xff] }
 0x8b5   : > { %1954 = vrot.lane.b32.xlu1 %v1935_v49, %s4088_s2  ;;  %s4905_s2 = sld [smem:[#allocation36_spill]] }
 0x8be   : > { %v3137_v58 = vpop.f32.mrb[10].mxu1 }
 0x8bf   : > { %v1938_v60 = vmul.f32 %v3713_v57, %v3137_v58  ;;  %v1914_v55 = vpop.f32.mrb[11].mxu1  ;;  %v2141_v58 = vld [vmem:[#allocation15 + $0xc8] sm:$0xff] }
 0x8c0   : > { %v1937_v61 = vmul.f32 %v3715_v59, %v1914_v55  ;;  %v2145_v59 = vld [vmem:[#allocation15 + $0xe8] sm:$0xff] }
 0x8c1   : > { %1967 = vrot.lane.b32.xlu1 %v1938_v60, %s4087_s8  ;;  %v2143_v60 = vld [vmem:[#allocation15 + $0xd8] sm:$0xff]  ;;  %v3361_v55 = vpack.c.bf16 %v2145_v59, %v2141_v58  ;;  %v2412_v59 = vld [vmem:[#allocation17 + $0x80] sm:$0xff] }
 0x8c2   : > { %1965 = vrot.lane.b32.xlu0 %v1937_v61, %s4087_s8  ;;  %v2147_v61 = vld [vmem:[#allocation15 + $0xf8] sm:$0xff]  ;;  %s2850_s8 = sshll.u32 %s4907_s12, 2  ;;  %s4909_s12 = sld [smem:[#allocation40_spill]] }
 0x916   : > { %v1946_v62 = vpop.permute.xlu1 %1945 }
 0x917   : > { %1951 = vst.msk [vmem:[#allocation5 + $0x8] sm:$0xff] %vm1949_vm3, %v1946_v62  ;;  %v1944_v63 = vpop.permute.xlu0 %1943  ;;  %v2140_v62 = vld [vmem:[#allocation15 + $0xc0] sm:$0xff] }
 0x918   : > { %1950 = vst.msk [vmem:[#allocation5] sm:$0xff] %vm1949_vm3, %v1944_v63  ;;  %v2144_v63 = vld [vmem:[#allocation15 + $0xe0] sm:$0xff] }
 0x923   : > { %v1957_v0 = vpop.permute.xlu1 %1956 }
 0x924   : > { %1962 = vst.msk [vmem:[#allocation5 + $0x8] sm:$0xff] %vm1960_vm4, %v1957_v0  ;;  %v3393_v0 = vpack.c.bf16 %v2147_v61, %v2143_v60  ;;  %v2413_v60 = vld [vmem:[#allocation17 + $0x88] sm:$0xff] }
 0x925   : > { %v3413_v61 = vpack.c.bf16 %v2413_v60, %v2412_v59  ;;  %v2435_v59 = vld [vmem:[#allocation17 + $0x138] sm:$0xff] }
 0x927   : > { %v1955_v1 = vpop.permute.xlu1 %1954 }
 0x928   : > { %1961 = vst.msk [vmem:[#allocation5] sm:$0xff] %vm1960_vm4, %v1955_v1  ;;  %v3363_v1 = vpack.c.bf16 %v2144_v63, %v2140_v62  ;;  %v2445_v62 = vld [vmem:[#allocation17 + $0x188] sm:$0xff] }
 0x933   : > { %v1968_v2 = vpop.permute.xlu1 %1967 }
 0x934   : > { %1973 = vst.msk [vmem:[#allocation5 + $0x8] sm:$0xff] %vm1971_vm5, %v1968_v2  ;;  %v1966_v3 = vpop.permute.xlu0 %1965  ;;  %v2142_v2 = vld [vmem:[#allocation15 + $0xd0] sm:$0xff] }
 0x935   : > { %1972 = vst.msk [vmem:[#allocation5] sm:$0xff] %vm1971_vm5, %v1966_v3  ;;  %v2146_v3 = vld [vmem:[#allocation15 + $0xf0] sm:$0xff] }
 0x93b   : > { %v1975_v5 = vld [vmem:[#allocation5 + $0x8] sm:$0xff] }
 0x93c   : > { %v1974_v4 = vld [vmem:[#allocation5] sm:$0xff] }
 0x93d   : > { %3170 = vmatprep.mubr.f32.mxu0 %v1974_v4  ;;  %v3395_v4 = vpack.c.bf16 %v2146_v3, %v2142_v2 }
 0x93e   : > { %3171 = vmatmul.mubr.f32.vlgmr.msra.gmra.mrb[6].mxu0 %v1975_v5  ;;  %v2149_v5 = vld [vmem:[#allocation15 + $0x108] sm:$0xff] }
 0x93f   : > { %3384 = vmatpush1.bf16.msra.mxu0 %v3383_v28  ;;  %v2160_v28 = vld [vmem:[#allocation15 + $0x160] sm:$0xff]  ;;  %2343 = vmatprep.mubr.f32.mxu0 %v4090_v38 }
 0x940   : > { %3386 = vmatprep.subr.bf16.mxu0 %v3385_v32  ;;  %v2165_v32 = vld [vmem:[#allocation15 + $0x188] sm:$0xff] }
 0x941   : > { %v3373_v39 = vpack.c.bf16 %v2169_v36, %v2165_v32  ;;  %v2431_v32 = vld [vmem:[#allocation17 + $0x118] sm:$0xff] }
 0x943   : > { %3388 = vmatpush1.bf16.msra.mxu0 %v3387_v27  ;;  %v2164_v27 = vld [vmem:[#allocation15 + $0x180] sm:$0xff] }
 0x944   : > { %3390 = vmatprep.subr.bf16.mxu0 %v3389_v34  ;;  %v2173_v34 = vld [vmem:[#allocation15 + $0x1c8] sm:$0xff] }
 0x945   : > { %v3377_v46 = vpack.c.bf16 %v2177_v44, %v2173_v34  ;;  %v2432_v34 = vld [vmem:[#allocation17 + $0x120] sm:$0xff]  ;;  %v2433_v44 = vld [vmem:[#allocation17 + $0x128] sm:$0xff] }
 0x947   : > { %3392 = vmatpush1.bf16.msra.mxu0 %v3391_v48  ;;  %v2179_v48 = vld [vmem:[#allocation15 + $0x1f8] sm:$0xff] }
 0x948   : > { %3394 = vmatprep.subr.bf16.mxu0 %v3393_v0 }
 0x94b   : > { %3396 = vmatpush1.bf16.msra.mxu0 %v3395_v4 }
 0xa11   : > { %v3172_v7 = vpop.f32.mrb[6].mxu0 }
 0xa12   : > { %v2071_v8 = vadd.f32 %v3172_v7, %v2844_v6  ;;  %v2065_v9 = vpop.f32.mrb[7].mxu0  ;;  %v2151_v7 = vld [vmem:[#allocation15 + $0x118] sm:$0xff] }
 0xa13   : > { %v2066_v10 = vadd.f32 %v2844_v6, %v2065_v9  ;;  %v2153_v6 = vld [vmem:[#allocation15 + $0x128] sm:$0xff]  ;;  %v2155_v9 = vld [vmem:[#allocation15 + $0x138] sm:$0xff] }
 0xa14   : > { %v4717_v11 = vadd.f32 %v2071_v8, %v4583_v19  ;;  %v2125_v19 = vld [vmem:[#allocation15 + $0x48] sm:$0xff]  ;;  %v3365_v8 = vpack.c.bf16 %v2153_v6, %v2149_v5  ;;  %v3397_v14 = vpack.c.bf16 %v2155_v9, %v2151_v7 }
 0xa15   : > { %v4720_v12 = vadd.f32 %v2066_v10, %v4580_v18  ;;  %v2129_v18 = vld [vmem:[#allocation15 + $0x68] sm:$0xff]  ;;  %v2148_v10 = vld [vmem:[#allocation15 + $0x100] sm:$0xff] }
 0xa16   : > { %2080 = vadd.xlane.f32.xlu1 %v4717_v11  ;;  %v3353_v31 = vpack.c.bf16 %v2129_v18, %v2125_v19  ;;  %v3367_v15 = vpack.c.bf16 %v2152_v13, %v2148_v10  ;;  %3398 = vmatprep.subr.bf16.mxu0 %v3397_v14  ;;  %v2156_v19 = vld [vmem:[#allocation15 + $0x140] sm:$0xff]  ;;  %v3401_v18 = vpack.c.bf16 %v2163_v25, %v2159_v23  ;;  %v2845_v7 = vld [vmem:[%s4904_s9] ss:$0 sm:$0xff]  ;;  %s4908_s9 = sld [smem:[#allocation39_spill]] }
 0xa17   : > { %2078 = vadd.xlane.f32.xlu0 %v4720_v12  ;;  %3400 = vmatpush1.bf16.msra.mxu0 %v3399_v20  ;;  %v3371_v29 = vpack.c.bf16 %v2160_v28, %v2156_v19  ;;  %v2396_v10 = vld [vmem:[#allocation17] sm:$0xff]  ;;  %v2397_v13 = vld [vmem:[#allocation17 + $0x8] sm:$0xff]  ;;  %v2415_v20 = vld [vmem:[#allocation17 + $0x98] sm:$0xff] }
 0xa18   : > { %3354 = vmatprep.subr.bf16.mxu1 %v3353_v31  ;;  %v2162_v31 = vld [vmem:[#allocation15 + $0x170] sm:$0xff]  ;;  %3402 = vmatprep.subr.bf16.mxu0 %v3401_v18  ;;  %v2428_v14 = vld [vmem:[#allocation17 + $0x100] sm:$0xff]  ;;  %v3415_v19 = vpack.c.bf16 %v2397_v13, %v2396_v10 }
 0xa19   : > { %3356 = vmatpush1.bf16.msra.mxu1 %v3355_v37  ;;  %v3403_v35 = vpack.c.bf16 %v2162_v31, %v2158_v30  ;;  %v2171_v37 = vld [vmem:[#allocation15 + $0x1b8] sm:$0xff]  ;;  %v2398_v18 = vld [vmem:[#allocation17 + $0x10] sm:$0xff]  ;;  %v3417_v30 = vpack.c.bf16 %v2415_v20, %v2414_v16  ;;  %v3449_v31 = vpack.c.bf16 %v2447_v22, %v2446_v21 }
 0xa1a   : > { %3358 = vmatprep.subr.bf16.mxu1 %v3357_v40  ;;  %v3405_v33 = vpack.c.bf16 %v2171_v37, %v2167_v26  ;;  %v2168_v40 = vld [vmem:[#allocation15 + $0x1a0] sm:$0xff]  ;;  %v2417_v26 = vld [vmem:[#allocation17 + $0xa8] sm:$0xff]  ;;  %v2454_v10 = vld [vmem:[#allocation17 + $0x1d0] sm:$0xff] }
 0xa1b   : > { %3404 = vmatpush1.bf16.msra.mxu0 %v3403_v35  ;;  %v3375_v42 = vpack.c.bf16 %v2168_v40, %v2164_v27  ;;  %v2416_v35 = vld [vmem:[#allocation17 + $0xa0] sm:$0xff]  ;;  %v2407_v16 = vld [vmem:[#allocation17 + $0x58] sm:$0xff]  ;;  %v2438_v21 = vld [vmem:[#allocation17 + $0x150] sm:$0xff] }
 0xa1c   : > { %3406 = vmatprep.subr.bf16.mxu0 %v3405_v33  ;;  %v2448_v37 = vld [vmem:[#allocation17 + $0x1a0] sm:$0xff]  ;;  %v3421_v41 = vpack.c.bf16 %v2417_v26, %v2416_v35  ;;  %v2439_v22 = vld [vmem:[#allocation17 + $0x158] sm:$0xff]  ;;  %v2441_v35 = vld [vmem:[#allocation17 + $0x168] sm:$0xff] }
 0xa1d   : > { %3360 = vmatpush1.bf16.msra.mxu1 %v3359_v47  ;;  %v2175_v47 = vld [vmem:[#allocation15 + $0x1d8] sm:$0xff]  ;;  %v2400_v40 = vld [vmem:[#allocation17 + $0x20] sm:$0xff]  ;;  %v2426_v26 = vld [vmem:[#allocation17 + $0xf0] sm:$0xff] }
 0xa1e   : > { %3362 = vmatprep.subr.bf16.mxu1 %v3361_v55  ;;  %v2444_v55 = vld [vmem:[#allocation17 + $0x180] sm:$0xff] }
 0xa1f   : > { %3408 = vmatpush1.bf16.msra.mxu0 %v3407_v45  ;;  %v3445_v63 = vpack.c.bf16 %v2445_v62, %v2444_v55  ;;  %v3423_v45 = vpack.c.bf16 %v2401_v43, %v2400_v40  ;;  %v2420_v55 = vld [vmem:[#allocation17 + $0xc0] sm:$0xff]  ;;  %v2411_v40 = vld [vmem:[#allocation17 + $0x78] sm:$0xff]  ;;  %v2442_v43 = vld [vmem:[#allocation17 + $0x170] sm:$0xff] }
 0xa20   : > { %v2452_v62 = vld [vmem:[#allocation17 + $0x1c0] sm:$0xff] }
 0xa21   : > { %3364 = vmatpush1.bf16.msra.mxu1 %v3363_v1 }
 0xa22   : > { %3366 = vmatprep.subr.bf16.mxu1 %v3365_v8  ;;  %v2846_v8 = vld [vmem:[%s4905_s2] ss:$0 sm:$0xff]  ;;  %s2634_s2 = sadd.s32 %s2850_s8, %s2849_s10  ;;  %s4091_s10 = smov [#allocation18]  }
 0xa23   : > { %s2851_s30 = sshll.u32 %s2634_s2, 7  ;;  %s3938_s8 = sshll.u32 %s4091_s10, 4  ;;  %s3939_s8 = int_to_ptr.vmem [resolvable:$false] %s3938_s8 }
 0xa24   : > { %s4760_s29 = scalar_lea.hbm %s4909_s12, %s2851_s30  ;;  %s3940_s2 = scalar_lea.vmem %s3939_s8, 512 }
 0xa25   : > { %3368 = vmatpush1.bf16.msra.mxu1 %v3367_v15  ;;  %v2429_v15 = vld [vmem:[#allocation17 + $0x108] sm:$0xff]  ;;  %p3941_p5 = scmp.lt.s32.totalorder %s4762_s21, %s3939_s8 }
 0xa26   : > { %3370 = vmatprep.subr.bf16.mxu1 %v3369_v24  ;;  %v3447_v28 = vpack.c.bf16 %v2429_v15, %v2428_v14  ;;  %v2455_v14 = vld [vmem:[#allocation17 + $0x1d8] sm:$0xff]  ;;  %v2406_v15 = vld [vmem:[#allocation17 + $0x50] sm:$0xff] }
 0xa27   : > { %v3435_v20 = vpack.c.bf16 %v2407_v16, %v2406_v15 }
 0xa29   : > { %3372 = vmatpush1.bf16.msra.mxu1 %v3371_v29  ;;  %v2399_v29 = vld [vmem:[#allocation17 + $0x18] sm:$0xff] }
 0xa2a   : > { %3374 = vmatprep.subr.bf16.mxu1 %v3373_v39  ;;  %v2449_v39 = vld [vmem:[#allocation17 + $0x1a8] sm:$0xff]  ;;  %v3419_v33 = vpack.c.bf16 %v2399_v29, %v2398_v18  ;;  %v2408_v29 = vld [vmem:[#allocation17 + $0x60] sm:$0xff] }
 0xa2b   : > { %v2457_v18 = vld [vmem:[#allocation17 + $0x1e8] sm:$0xff] }
 0xa2d   : > { %3376 = vmatpush1.bf16.msra.mxu1 %v3375_v42  ;;  %v3453_v42 = vpack.c.bf16 %v2449_v39, %v2448_v37  ;;  %v2427_v37 = vld [vmem:[#allocation17 + $0xf8] sm:$0xff]  ;;  %v2458_v39 = vld [vmem:[#allocation17 + $0x1f0] sm:$0xff] }
 0xa2e   : > { %3378 = vmatprep.subr.bf16.mxu1 %v3377_v46  ;;  %v3455_v46 = vpack.c.bf16 %v2433_v44, %v2432_v34  ;;  %v2443_v34 = vld [vmem:[#allocation17 + $0x178] sm:$0xff] }
 0xa2f   : > { %v3475_v44 = vpack.c.bf16 %v2443_v34, %v2442_v43 }
 0xaa3   : > { %v2081_v49 = vpop.xlane.xlu1 %2080 }
 0xaa4   : > { %v2079_v50 = vpop.xlane.xlu0 %2078  ;;  %v2083_v51 = vmul.f32 0.0078125, %v2081_v49  ;;  %v2172_v49 = vld [vmem:[#allocation15 + $0x1c0] sm:$0xff] }
 0xaa5   : > { %v2082_v52 = vmul.f32 0.0078125, %v2079_v50  ;;  %v3409_v50 = vpack.c.bf16 %v2179_v48, %v2175_v47  ;;  %v2419_v47 = vld [vmem:[#allocation17 + $0xb8] sm:$0xff]  ;;  %v2450_v48 = vld [vmem:[#allocation17 + $0x1b0] sm:$0xff] }
 0xaa6   : > { %v4728_v54 = vsub.f32 %v4717_v11, %v2083_v51  ;;  %v2176_v51 = vld [vmem:[#allocation15 + $0x1e0] sm:$0xff] }
 0xaa7   : > { %v4725_v53 = vsub.f32 %v4720_v12, %v2082_v52  ;;  %v2174_v52 = vld [vmem:[#allocation15 + $0x1d0] sm:$0xff]  ;;  %3410 = vmatprep.subr.bf16.mxu0 %v3409_v50  ;;  %v2451_v50 = vld [vmem:[#allocation17 + $0x1b8] sm:$0xff] }
 0xaa8   : > { %v2087_v57 = vmul.f32 %v4728_v54, %v4728_v54 }
 0xaa9   : > { %v2086_v56 = vmul.f32 %v4725_v53, %v4725_v53 }
 0xaab   : > { %2088 = vadd.xlane.f32.xlu0 %v2086_v56  ;;  %v2178_v56 = vld [vmem:[#allocation15 + $0x1f0] sm:$0xff] }
 0xaac   : > { %v3411_v58 = vpack.c.bf16 %v2178_v56, %v2174_v52  ;;  %v2403_v52 = vld [vmem:[#allocation17 + $0x38] sm:$0xff]  ;;  %v3457_v56 = vpack.c.bf16 %v2451_v50, %v2450_v48  ;;  %v2180_v48 = vld [vmem:[%s4906_s5] sm:$0xf] }
 0xaae   : > { %3412 = vmatpush1.bf16.msra.mxu0 %v3411_v58  ;;  %v2434_v58 = vld [vmem:[#allocation17 + $0x130] sm:$0xff] }
 0xaaf   : > { %2090 = vadd.xlane.f32.xlu0 %v2087_v57  ;;  %v3379_v57 = vpack.c.bf16 %v2176_v51, %v2172_v49  ;;  %3446 = vmatprep.subr.bf16.mxu0 %v3445_v63  ;;  %v2402_v51 = vld [vmem:[#allocation17 + $0x30] sm:$0xff]  ;;  %v3459_v60 = vpack.c.bf16 %v2435_v59, %v2434_v58 }
 0xab1   : > { %3380 = vmatpush1.bf16.msra.mxu1 %v3379_v57  ;;  %v3427_v57 = vpack.c.bf16 %v2403_v52, %v2402_v51 }
 0xab2   : > { %3414 = vmatprep.subr.bf16.mxu1 %v3413_v61  ;;  %v2421_v61 = vld [vmem:[#allocation17 + $0xc8] sm:$0xff] }
 0xab3   : > { %v3429_v63 = vpack.c.bf16 %v2421_v61, %v2420_v55 }
 0xb38   : > { %v2089_v0 = vpop.xlane.xlu0 %2088 }
 0xb39   : > { %v2092_v1 = vmul.f32 0.0078125, %v2089_v0  ;;  %v2453_v0 = vld [vmem:[#allocation17 + $0x1c8] sm:$0xff] }
 0xb3b   : > { %v2094_v2 = vadd.f32 1e-06, %v2092_v1  ;;  %v2404_v1 = vld [vmem:[#allocation17 + $0x40] sm:$0xff] }
 0xb3c   : > { %v2091_v3 = vpop.xlane.xlu0 %2090 }
 0xb3d   : > { %3716 = vrsqrt.f32 %v2094_v2  ;;  %v2093_v4 = vmul.f32 0.0078125, %v2091_v3  ;;  %v2405_v2 = vld [vmem:[#allocation17 + $0x48] sm:$0xff]  ;;  %v3461_v3 = vpack.c.bf16 %v2453_v0, %v2452_v62 }
 0xb3f   : > { %v2095_v5 = vadd.f32 1e-06, %v2093_v4  ;;  %v3431_v4 = vpack.c.bf16 %v2405_v2, %v2404_v1 }
 0xb41   : > { %3718 = vrsqrt.f32 %v2095_v5  ;;  %v2436_v5 = vld [vmem:[#allocation17 + $0x140] sm:$0xff] }
 0xb47   : > { %v3717_v6 = vpop.eup %3716 }
 0xb48   : > { %v2098_v9 = vmul.f32 %v3717_v6, %v4725_v53  ;;  %v2430_v53 = vld [vmem:[#allocation17 + $0x110] sm:$0xff]  ;;  %v2437_v6 = vld [vmem:[#allocation17 + $0x148] sm:$0xff] }
 0xb49   : > { %v3451_v27 = vpack.c.bf16 %v2431_v32, %v2430_v53  ;;  %v2440_v32 = vld [vmem:[#allocation17 + $0x160] sm:$0xff] }
 0xb4a   : > { %v2106_v17 = vmul.f32 %v2845_v7, %v2098_v9  ;;  %v2423_v9 = vld [vmem:[#allocation17 + $0xd8] sm:$0xff] }
 0xb4b   : > { %v3719_v23 = vpop.eup %3718 }
 0xb4c   : > { %v2114_v24 = vadd.f32 %v2846_v8, %v2106_v17  ;;  %v2099_v25 = vmul.f32 %v3719_v23, %v4728_v54  ;;  %v3465_v17 = vpack.c.bf16 %v2455_v14, %v2454_v10  ;;  %v3467_v23 = vpack.c.bf16 %v2439_v22, %v2438_v21 }
 0xb4e   : > { %2267 = vmatmul.mubr.f32.vlgmr.msra.gmra.mrb[12].mxu1 %v2114_v24  ;;  %2344 = vmatmul.mubr.f32.vlgmr.msra.gmra.mrb[8].mxu0 %v2114_v24  ;;  %v2107_v36 = vmul.f32 %v2845_v7, %v2099_v25  ;;  %v3463_v7 = vpack.c.bf16 %v2437_v6, %v2436_v5  ;;  %v2424_v24 = vld [vmem:[#allocation17 + $0xe0] sm:$0xff]  ;;  %v2425_v25 = vld [vmem:[#allocation17 + $0xe8] sm:$0xff] }
 0xb4f   : > { %2272 = vmatprep.mubr.f32.mxu1 %v4090_v38  ;;  %2349 = vmatprep.mubr.f32.mxu0 %v4090_v38  ;;  %v2418_v38 = vld [vmem:[#allocation17 + $0xb0] sm:$0xff] }
 0xb50   : > { %v2115_v54 = vadd.f32 %v2846_v8, %v2107_v36  ;;  %3416 = vmatpush3.bf16.msra.mxu1 %v3415_v19  ;;  %3448 = vmatpush3.bf16.msra.mxu0 %v3447_v28  ;;  %v3425_v49 = vpack.c.bf16 %v2419_v47, %v2418_v38  ;;  %v2422_v8 = vld [vmem:[#allocation17 + $0xd0] sm:$0xff]  ;;  %v2456_v19 = vld [vmem:[#allocation17 + $0x1e0] sm:$0xff]  ;;  %v3437_v28 = vpack.c.bf16 %v2425_v25, %v2424_v24 }
 0xb51   : > { %3418 = vmatprep.subr.bf16.mxu1 %v3417_v30  ;;  %3450 = vmatprep.subr.bf16.mxu0 %v3449_v31  ;;  %v3433_v13 = vpack.c.bf16 %v2423_v9, %v2422_v8  ;;  %v2409_v30 = vld [vmem:[#allocation17 + $0x68] sm:$0xff]  ;;  %v3469_v31 = vpack.c.bf16 %v2457_v18, %v2456_v19  ;;  %v3471_v36 = vpack.c.bf16 %v2441_v35, %v2440_v32 }
 0xb52   : > { %2273 = vmatmul.mubr.f32.gmra.mrb[14].mxu1 %v2115_v54  ;;  %2350 = vmatmul.mubr.f32.gmra.mrb[10].mxu0 %v2115_v54  ;;  %v3439_v53 = vpack.c.bf16 %v2409_v30, %v2408_v29  ;;  %v3441_v54 = vpack.c.bf16 %v2427_v37, %v2426_v26 }
 0xb54   : > { %3420 = vmatpush3.bf16.msra.mxu1 %v3419_v33  ;;  %3452 = vmatpush3.bf16.msra.mxu0 %v3451_v27  ;;  %v2459_v33 = vld [vmem:[#allocation17 + $0x1f8] sm:$0xff]  ;;  %v2410_v27 = vld [vmem:[#allocation17 + $0x70] sm:$0xff] }
 0xb55   : > { %3422 = vmatprep.subr.bf16.mxu1 %v3421_v41  ;;  %3454 = vmatprep.subr.bf16.mxu0 %v3453_v42  ;;  %v3473_v41 = vpack.c.bf16 %v2459_v33, %v2458_v39  ;;  %v3443_v42 = vpack.c.bf16 %v2411_v40, %v2410_v27 }
 0xb58   : > { %3424 = vmatpush3.bf16.msra.mxu1 %v3423_v45  ;;  %3456 = vmatpush3.bf16.msra.mxu0 %v3455_v46  ;;  %v2182_v45 = vlaneseq }
 0xb59   : > { %3426 = vmatprep.subr.bf16.mxu1 %v3425_v49  ;;  %3458 = vmatprep.subr.bf16.mxu0 %v3457_v56 }
 0xb5a   : > { %v2183_v46 = vshrl.u32 %v2182_v45, 7 }
 0xb5c   : > { %3428 = vmatpush3.bf16.msra.mxu1 %v3427_v57  ;;  %3460 = vmatpush3.bf16.msra.mxu0 %v3459_v60  ;;  %v2184_v38 = vsub.s32 0, %v2183_v46  ;;  %v2192_v47 = vsub.s32 2, %v2183_v46  ;;  %v2188_v49 = vsub.s32 1, %v2183_v46  ;;  %v2196_v50 = vsub.s32 3, %v2183_v46 }
 0xb5d   : > { %3430 = vmatprep.subr.bf16.mxu1 %v3429_v63  ;;  %3462 = vmatprep.subr.bf16.mxu0 %v3461_v3 }
 0xb5e   : > { %v2185_v51 = vrot.slane %v2180_v48, %v2184_v38  ;;  %v2193_v52 = vrot.slane %v2180_v48, %v2192_v47  ;;  %v2189_v56 = vrot.slane %v2180_v48, %v2188_v49  ;;  %v2197_v57 = vrot.slane %v2180_v48, %v2196_v50 }
 0xb60   : > { %3432 = vmatpush3.bf16.msra.mxu1 %v3431_v4  ;;  %3464 = vmatpush3.bf16.msra.mxu0 %v3463_v7 }
 0xb61   : > { %3434 = vmatprep.subr.bf16.mxu1 %v3433_v13  ;;  %3466 = vmatprep.subr.bf16.mxu0 %v3465_v17 }
 0xb64   : > { %3436 = vmatpush3.bf16.msra.mxu1 %v3435_v20  ;;  %3468 = vmatpush3.bf16.msra.mxu0 %v3467_v23 }
 0xb65   : > { %3438 = vmatprep.subr.bf16.mxu1 %v3437_v28  ;;  %3470 = vmatprep.subr.bf16.mxu0 %v3469_v31 }
 0xb68   : > { %3440 = vmatpush3.bf16.msra.mxu1 %v3439_v53  ;;  %3472 = vmatpush3.bf16.msra.mxu0 %v3471_v36 }
 0xb69   : > { %3442 = vmatprep.subr.bf16.mxu1 %v3441_v54  ;;  %3474 = vmatprep.subr.bf16.mxu0 %v3473_v41 }
 0xb6c   : > { %3444 = vmatpush3.bf16.msra.mxu1 %v3443_v42  ;;  %3476 = vmatpush3.bf16.msra.mxu0 %v3475_v44 }
 0xc21   : > { %v2268_v58 = vpop.f32.mrb[12].mxu1  ;;  %v2345_v59 = vpop.f32.mrb[8].mxu0 }
 0xc22   : > { %v2269_v60 = vadd.f32 %v2268_v58, %v2185_v51  ;;  %v2346_v55 = vadd.f32 %v2345_v59, %v2193_v52  ;;  %v2270_v61 = vpop.f32.mrb[13].mxu1  ;;  %v2347_v62 = vpop.f32.mrb[9].mxu0 }
 0xc23   : > { %v2271_v63 = vadd.f32 %v2270_v61, %v2189_v56  ;;  %v2348_v0 = vadd.f32 %v2347_v62, %v2197_v57 }
 0xc24   : > { %v2364_v1 = vmul.f32 0.70710677, %v2269_v60  ;;  %v2366_v2 = vmul.f32 0.70710677, %v2346_v55  ;;  %v2356_v29 = vmul.f32 0.5, %v2269_v60  ;;  %v2358_v32 = vmul.f32 0.5, %v2346_v55 }
 0xc25   : > { %v2365_v3 = vmul.f32 0.70710677, %v2271_v63  ;;  %v2367_v4 = vmul.f32 0.70710677, %v2348_v0  ;;  %v2274_v5 = vpop.f32.mrb[14].mxu1  ;;  %v2351_v6 = vpop.f32.mrb[10].mxu0 }
 0xc26   : > { %3720 = verf.f32 %v2364_v1  ;;  %v2275_v7 = vadd.f32 %v2274_v5, %v2185_v51  ;;  %v2352_v8 = vadd.f32 %v2351_v6, %v2193_v52  ;;  %v2276_v9 = vpop.f32.mrb[15].mxu1  ;;  %v2353_v10 = vpop.f32.mrb[11].mxu0  ;;  %v2357_v28 = vmul.f32 0.5, %v2271_v63  ;;  %v2847_v51 = vld [vmem:[%s4908_s9] ss:$0 sm:$0xff]  ;;  %s3934_s9 = scalar_lea.vmem %s4762_s21, 256 }
 0xc27   : > { %3722 = verf.f32 %v2366_v2  ;;  %v2277_v13 = vadd.f32 %v2276_v9, %v2189_v56  ;;  %v2354_v14 = vadd.f32 %v2353_v10, %v2197_v57  ;;  %v2359_v30 = vmul.f32 0.5, %v2348_v0  ;;  %p3935_p7 = scmp.ne.s32.totalorder %s4762_s21, %s3934_s9  ;;  %p3942_p9 = scmp.lt.s32.totalorder %s3940_s2, %s3934_s9 }
 0xc28   : > { %3724 = verf.f32 %v2365_v3  ;;  %v2368_v15 = vmul.f32 0.70710677, %v2275_v7  ;;  %v2370_v16 = vmul.f32 0.70710677, %v2352_v8  ;;  %v2360_v43 = vmul.f32 0.5, %v2275_v7 }
 0xc29   : > { %3726 = verf.f32 %v2367_v4  ;;  %v2369_v17 = vmul.f32 0.70710677, %v2277_v13  ;;  %v2371_v20 = vmul.f32 0.70710677, %v2354_v14  ;;  %v2361_v41 = vmul.f32 0.5, %v2277_v13  ;;  %p3936_p12 = pnand %p3935_p7, %p4910_p6  ;;  %p3943_p1 = por %p3942_p9, %p3941_p5 }
 0xc2a   : > { %3728 = verf.f32 %v2368_v15  ;;  %v2363_v34 = vmul.f32 0.5, %v2354_v14  ;;  %v2362_v45 = vmul.f32 0.5, %v2352_v8 }
 0xc2b   : > { %3730 = verf.f32 %v2370_v16  ;;  %p3937_p3 = pneg %p3936_p12 }
 0xc2c   : > { %3732 = verf.f32 %v2369_v17 }
 0xc2d   : > { %3734 = verf.f32 %v2371_v20  ;;  %p3944_p11 = pnand %p3943_p1, %p3937_p3 }
 0xc30   : > { %v3721_v21 = vpop.eup %3720 }
 0xc31   : > { %v3723_v22 = vpop.eup %3722  ;;  %v2380_v24 = vadd.f32 1.0, %v3721_v21 }
 0xc32   : > { %v3725_v23 = vpop.eup %3724  ;;  %v2382_v19 = vadd.f32 1.0, %v3723_v22 }
 0xc33   : > { %v3727_v25 = vpop.eup %3726  ;;  %v2381_v18 = vadd.f32 1.0, %v3725_v23  ;;  %v2388_v26 = vmul.f32 %v2380_v24, %v2356_v29 }
 0xc34   : > { %v2383_v31 = vadd.f32 1.0, %v3727_v25  ;;  %v3729_v53 = vpop.eup %3728  ;;  %v2390_v54 = vmul.f32 %v2382_v19, %v2358_v32 }
 0xc35   : > { %v2389_v35 = vmul.f32 %v2381_v18, %v2357_v28  ;;  %v3731_v36 = vpop.eup %3730  ;;  %v2384_v33 = vadd.f32 1.0, %v3729_v53 }
 0xc36   : > { %v2391_v37 = vmul.f32 %v2383_v31, %v2359_v30  ;;  %v3733_v39 = vpop.eup %3732  ;;  %v2386_v40 = vadd.f32 1.0, %v3731_v36 }
 0xc37   : > { %2531 = vmatprep.mubr.f32.mxu1 %v2389_v35  ;;  %v3735_v27 = vpop.eup %3734  ;;  %v2385_v42 = vadd.f32 1.0, %v3733_v39  ;;  %v2392_v47 = vmul.f32 %v2384_v33, %v2360_v43 }
 0xc38   : > { %2606 = vmatprep.mubr.f32.mxu0 %v2391_v37  ;;  %2532 = vmatmul.mubr.f32.vlgmr.msra.gmra.mrb[16].mxu1 %v2388_v26  ;;  %v2387_v44 = vadd.f32 1.0, %v3735_v27  ;;  %v2394_v48 = vmul.f32 %v2386_v40, %v2362_v45 }
 0xc39   : > { %2607 = vmatmul.mubr.f32.vlgmr.msra.gmra.mrb[12].mxu0 %v2390_v54  ;;  %v2393_v46 = vmul.f32 %v2385_v42, %v2361_v41 }
 0xc3a   : > { %v2395_v38 = vmul.f32 %v2387_v44, %v2363_v34 }
 0xc3b   : > { %2536 = vmatprep.mubr.f32.mxu1 %v2393_v46 }
 0xc3c   : > { %2611 = vmatprep.mubr.f32.mxu0 %v2395_v38  ;;  %2537 = vmatmul.mubr.f32.gmra.mrb[18].mxu1 %v2392_v47 }
 0xc3d   : > { %2612 = vmatmul.mubr.f32.gmra.mrb[14].mxu0 %v2394_v48 }
 0xd0b   : > { %v2971_v49 = vpop.f32.mrb[16].mxu1 }
 0xd0c   : > { %v3009_v50 = vpop.f32.mrb[12].mxu0  ;;  %v2972_v52 = vpop.f32.mrb[17].mxu1 }
 0xd0d   : > { %v2973_v56 = vadd.f32 %v2972_v52, %v2971_v49  ;;  %v3010_v57 = vpop.f32.mrb[13].mxu0 }
 0xd0e   : > { %v3011_v58 = vadd.f32 %v3010_v57, %v3009_v50 }
 0xd0f   : > { %v2534_v59 = vadd.f32 %v2973_v56, %v2847_v51  ;;  %v2974_v60 = vpop.f32.mrb[18].mxu1 }
 0xd10   : > { %v3012_v61 = vpop.f32.mrb[14].mxu0  ;;  %v2975_v62 = vpop.f32.mrb[19].mxu1 }
 0xd11   : > { %v2609_v55 = vadd.f32 %v3011_v58, %v2534_v59  ;;  %v2976_v63 = vadd.f32 %v2975_v62, %v2974_v60  ;;  %v3013_v0 = vpop.f32.mrb[15].mxu0 }
 0xd12   : > { %v3014_v2 = vadd.f32 %v3013_v0, %v3012_v61 }
 0xd13   : > { %v2617_v1 = vadd.f32 %v2609_v55, %v4720_v12  ;;  %v2539_v3 = vadd.f32 %v2976_v63, %v2847_v51 }
 0xd15   : > { %2619 = vst [vmem:[%s4505_s16] sm:$0xff] %v2617_v1  ;;  %v2614_v4 = vadd.f32 %v3014_v2, %v2539_v3 }
 0xd17   : > { %v2618_v5 = vadd.f32 %v2614_v4, %v4717_v11 }
 0xd19   : > { %2620 = vst [vmem:[%s4505_s16 + $0x8] sm:$0xff] %v2618_v5 }
 0xd1a   : > { %3947 = shalt.err (!%p3944_p11)
}
 0xd1b   : > { %s3948_s0 = scalar_lea.hbm %s4760_s29, 256  ;;  %s3952_s17 = scalar_lea.hbm %s4909_s12, 1024 }
 0xd1c   : > { %p3949_p4 = scmp.ne.s32.totalorder %s4760_s29, %s3948_s0  ;;  %p3953_p2 = scmp.lt.u32.totalorder %s4760_s29, %s4909_s12 }
 0xd1d   : > { %p3954_p8 = scmp.lt.u32.totalorder %s3952_s17, %s3948_s0  ;;  %p3956_p7 = scmp.lt.u32.totalorder %s3948_s0, %s4760_s29 }
 0xd1e   : > { %p3950_p13 = pnand %p3949_p4, %p4910_p6 }
 0xd1f   : > { %p3955_p10 = por %p3954_p8, %p3953_p2 }
 0xd20   : > { %p3951_p0 = pneg %p3950_p13 }
 0xd21   : > { %p3957_p12 = por %p3956_p7, %p3955_p10 }
 0xd23   : > { %p3958_p3 = pnand %p3957_p12, %p3951_p0 }
 0xd25   : > { %3961 = shalt.err (!%p3958_p3)
}
 0xd26   : > { %s4092_s9 = smov 128   ;;  %s4093_s8 = smov 8  }
 0xd27   : > { %3519 = dma.vmem_to_hbm [thread:$0]  (%p4910_p6), %s4762_s21, 256, %s4760_s29, %s4768_s11, %s4092_s9, %s4092_s9, %s4093_s8  }
 0xd28 PF: > { %p3561_p5 = scmp.ge.s32.totalorder %s4068_s28, 2  ;;  %s2652_s2 = sand.u32 1, %s4028_s18  }
 0xd29   : > { %p4911_p9 = scmp.ne.s32.totalorder %s4887_s6, 0  ;;  %s2653_s0 = scalar_lea.sflag [#allocation8], %s2652_s2 }
 0xd2b   : > { %p3545_p1 = pnand %p3561_p5, %p4911_p9 }
 0xd2d   : > { %4023 = dma.done.wait (!%p3545_p1), %s2653_s0, 256  }
 0xd2e   : > { %4025 = vsyncadd (!%p3545_p1), %s2653_s0, 4294967040  ;;  %s34_s28 = sadd.s32 1, %s4068_s28   ;;  %s4912_s4 = smov %s4925_s25 }
 0xd2f   : > { %p31_p11 = scmp.ge.s32.totalorder %s34_s28, 6   ;;  %s4913_s29 = smov %s4929_s24 }
 0xd30   : > { %s4914_s18 = smov %s4032_s19  ;;  %s4915_s19 = smov %s4036_s20 }
 0xd31   : > { %s4916_s20 = smov %s4428_s14  ;;  %s4917_s21 = smov %s4044_s22 }
 0xd32   : > { %s4918_s22 = smov %s4048_s23  ;;  %s4919_s23 = smov %s4425_s1 }
 0xd33   : > { %s4920_s24 = smov %s4060_s26  ;;  %s4921_s25 = smov %s4064_s27 }
 0xd34   : > { %s4922_s26 = smov %s4912_s4  ;;  %s4923_s27 = smov %s4913_s29 }
 0xd35   :  { %33 = sbr.rel (!%p31_p11) target bundleno = 26 (0x1a), region = 163 }
 0xd3c   :  { %2658 = vsyncpa [#allocation7], 1 }
 0xd3d   :  { %2660 = vsyncpa [#allocation7 + $0x1], 1 }
 0xd3e   :  { %2661 = vsyncpa [#allocation10], 1 }
 0xd3f   :  { %2662 = vsyncpa [#allocation13], 1 }
 0xd40   :  { %2663 = vsyncpa [#allocation16], 1 }
 0xd41   :  { %2664 = vsyncpa [#allocation8], 1 }
 0xd42   :  { %2666 = vsyncpa [#allocation8 + $0x1], 1 }

</bundles_post_ra>
